<compile_context>
chip_gen: v7x
topology: tpu7x:2x2x1
jax: 0.10.0
libtpu: 0.0.40
codegen_flags: <defaults>
</compile_context>

<pallas_src>
import numpy as np
import jax
import jax.numpy as jnp
from jax.experimental import pallas as pl
from jax.experimental.pallas import tpu as pltpu


def _round_up(v, m):
    return (v + m - 1) // m * m


def _vmem_capacity_bytes():
    """Physical per-core VMEM, with a conservative (v7x) fallback."""
    try:
        info = pltpu.get_tpu_info()
        cap = getattr(info, "vmem_capacity_bytes", None)
        if cap:
            return int(cap)
    except Exception:
        pass
    return 64 << 20


def _pick_tiles(n, num_rel, f, h, o):
    """Lane-dense pads + generation-aware row-tile (TM) selection."""
    fp = _round_up(f, 128)
    hp = _round_up(h, 128)
    op = _round_up(o, 128)
    np0 = _round_up(n, 32)                       # int8 sublane tile = 32

    cap = _vmem_capacity_bytes()
    # Scoped-VMEM ceiling: ~100 MiB on 128-MiB chips (v5e/v6e), 48 MiB on v7x.
    limit = (100 << 20) if cap >= (128 << 20) else (48 << 20)

    def need(tm, np_cols):
        a_slab = 2 * num_rel * tm * np_cols          # int8 A slab, double-buffered
        a_cast = 2 * num_rel * tm * np_cols          # bf16 copy from in-kernel cast
        msgs = num_rel * tm * fp * 4                 # fused messenger result (f32)
        inter = (tm * fp * 4 + 2 * tm * hp * 4       # x_self + msg/h live values
                 + tm * num_rel * hp * 2 + tm * op * 4)
        outb = 2 * tm * op * 4                       # out block, double-buffered
        inv = 2 * (np_cols * fp * 2 + num_rel * fp * hp * 2 + num_rel * 8 * hp * 4
                   + num_rel * hp * op * 2 + 8 * op * 4)   # invariants (worst case)
        return a_slab + a_cast + msgs + inter + outb + inv + (6 << 20)

    tm = 32
    cand = 32
    while cand <= min(512, np0):
        npc = _round_up(np0, cand)
        if need(cand, npc) <= limit:
            tm = cand
        cand += 32
    # Megacore (v7x): keep >= 2 grid steps along the parallel row-tile axis.
    if np0 >= 64:
        half = max(32, (np0 // 64) * 32)             # largest mult. of 32 <= np0/2
        tm = min(tm, half)

    np_rows = _round_up(np0, tm)
    est = need(tm, np_rows)
    vmem_limit = int(min(max(est, 32 << 20), limit))
    return tm, np_rows, fp, hp, op, vmem_limit


def _sin_conv_kernel(eps_ref,     # SMEM (R,)           f32
                     a_ref,       # VMEM (R*TM, Np)     int8   blocked adjacency slab
                     xb_ref,      # VMEM (Np, Fp)       bf16   whole x
                     w1_ref,      # VMEM (R, Fp, Hp)    bf16
                     b1_ref,      # VMEM (R, 1, Hp)     f32
                     wf_ref,      # VMEM (R*Hp, Op)     bf16
                     bf_ref,      # VMEM (1, Op)        f32
                     out_ref):    # VMEM (TM, Op)       f32
    num_rel = w1_ref.shape[0]
    tm = out_ref.shape[0]

    x_bf = xb_ref[...]

    # GIN self-term rows for this tile, sliced out of the resident bf16 x
    # (no second x HBM stream).
    row0 = pl.multiple_of(pl.program_id(0) * tm, tm)
    x_self = xb_ref[pl.ds(row0, tm), :].astype(jnp.float32)

    # Fused messenger matmul: one MXU call with M = R*TM. int8 -> bf16 on the VPU.
    a_bf = a_ref[...].astype(jnp.bfloat16)
    msg_all = jnp.dot(a_bf, x_bf, preferred_element_type=jnp.float32)   # (R*TM, Fp)

    hs = []
    for r in range(num_rel):                       # statically unrolled
        msg = msg_all[r * tm:(r + 1) * tm, :] + (1.0 + eps_ref[r]) * x_self
        # rel_update_net[r] = Linear(F, H) + ReLU
        h = jnp.dot(msg.astype(jnp.bfloat16), w1_ref[r],
                    preferred_element_type=jnp.float32) + b1_ref[r]
        hs.append(jnp.maximum(h, 0.0).astype(jnp.bfloat16))

    # final_net: folded concat + Linear(R*H, O) + ReLU as ONE K = R*Hp matmul.
    h_cat = jnp.concatenate(hs, axis=-1)           # (TM, R*Hp)
    acc = jnp.dot(h_cat, wf_ref[...], preferred_element_type=jnp.float32)
    out_ref[...] = jnp.maximum(acc + bf_ref[...], 0.0).astype(out_ref.dtype)


def sin_conv_forward(x, edge_index, edge_type, eps, W1, b1, Wf, bf,
                     num_relations):
    """x: (N, F) f32. edge_index: (2, E) int32 [src; dst]. edge_type: (E,) int32."""
    N, F = x.shape
    R = num_relations
    H = W1.shape[-1]
    O = Wf.shape[-1]

    TM, Np, Fp, Hp, Op, vmem_limit = _pick_tiles(N, R, F, H, O)
    G = Np // TM

    # Glue: dense per-relation adjacency in blocked relation-major row layout.
    # row = (dst // TM) * R*TM + edge_type * TM + dst % TM, so each grid step's
    # A block is one contiguous (R*TM, Np) int8 slab.
    # int8 is exact while per-(relation, dst, src) edge multiplicity <= 127.
    src = edge_index[0].astype(jnp.int32)
    dst = edge_index[1].astype(jnp.int32)
    et = edge_type.astype(jnp.int32)
    row = (dst // TM) * (R * TM) + et * TM + (dst % TM)
    A = jnp.zeros((G * R * TM, Np), jnp.int32).at[row, src].add(1).astype(jnp.int8)

    # Lane-dense padding (exact: zero pads stay zero through every stage).
    x_bf = jnp.pad(x, ((0, Np - N), (0, Fp - F))).astype(jnp.bfloat16)
    W1_p = jnp.pad(W1, ((0, 0), (0, Fp - F), (0, Hp - H))).astype(jnp.bfloat16)
    b1_p = jnp.pad(b1, ((0, 0), (0, Hp - H))).reshape(R, 1, Hp)          # f32
    Wf_p = jnp.pad(Wf.reshape(R, H, O),
                   ((0, 0), (0, Hp - H), (0, Op - O))
                   ).reshape(R * Hp, Op).astype(jnp.bfloat16)
    bf_p = jnp.pad(bf, (0, Op - O)).reshape(1, Op)                       # f32

    def make_specs(single_buffer_invariants):
        inv = ({"pipeline_mode": pl.Buffered(1)}
               if single_buffer_invariants else {})
        in_specs = [
            pl.BlockSpec(memory_space=pltpu.MemorySpace.SMEM),           # eps
            pl.BlockSpec((R * TM, Np), lambda m: (m, 0)),                # A slab
            pl.BlockSpec((Np, Fp), lambda m: (0, 0), **inv),             # x (whole)
            pl.BlockSpec((R, Fp, Hp), lambda m: (0, 0, 0), **inv),       # W1
            pl.BlockSpec((R, 1, Hp), lambda m: (0, 0, 0), **inv),        # b1
            pl.BlockSpec((R * Hp, Op), lambda m: (0, 0), **inv),         # Wf
            pl.BlockSpec((1, Op), lambda m: (0, 0), **inv),              # bf
        ]
        out_specs = pl.BlockSpec((TM, Op), lambda m: (m, 0))
        return in_specs, out_specs

    def build(single_buffer_invariants):
        in_specs, out_specs = make_specs(single_buffer_invariants)
        grid_spec = pltpu.PrefetchScalarGridSpec(
            num_scalar_prefetch=0,
            grid=(Np // TM,),
            in_specs=in_specs,
            out_specs=out_specs,
        )
        return pl.pallas_call(
            _sin_conv_kernel,
            out_shape=jax.ShapeDtypeStruct((Np, Op), jnp.float32),
            grid_spec=grid_spec,
            compiler_params=pltpu.CompilerParams(
                dimension_semantics=("parallel",),
                vmem_limit_bytes=vmem_limit),
        )

    args = (eps, A, x_bf, W1_p, b1_p, Wf_p, bf_p)
    try:
        # Preferred: grid-invariant operands single-buffered (frees VMEM for A).
        out = jax.block_until_ready(build(True)(*args))
    except Exception:
        # Fallback: default double-buffering (still correct, slightly more VMEM).
        out = jax.block_until_ready(build(False)(*args))

    return out[:N, :O]


def sin_conv_reference(x, edge_index, edge_type, eps, W1, b1, Wf, bf,
                       num_relations):
    R = num_relations
    N = x.shape[0]
    A = jnp.zeros((R, N, N), jnp.float32).at[
        edge_type, edge_index[1], edge_index[0]].add(1.0)
    msgs = jnp.einsum('rij,jf->rif', A, x) + (1.0 + eps)[:, None, None] * x[None]
    h = jnp.maximum(jnp.einsum('rif,rfh->rih', msgs, W1) + b1[:, None, :], 0.0)
    cat = jnp.concatenate([h[r] for r in range(R)], axis=-1)
    return jnp.maximum(cat @ Wf + bf, 0.0)


if __name__ == "__main__":
    # Small shapes: N=16 cells, input_dim=16, hidden_dim=32, output_dim=16,
    # num_relations=3 ('bur'), E=48 edges.
    N, F, H, O, R, E = 16, 16, 32, 16, 3, 48
    eps_init = 0.1

    key = jax.random.PRNGKey(0)
    kx, ke, kt, k1, k2, k3, k4 = jax.random.split(key, 7)

    x = jax.random.normal(kx, (N, F), jnp.float32)
    edge_index = jax.random.randint(ke, (2, E), 0, N, jnp.int32)
    edge_type = jax.random.randint(kt, (E,), 0, R, jnp.int32)

    # Deterministic parameter init (PyTorch-Linear-style uniform scaling).
    eps = jnp.full((R,), eps_init, jnp.float32)                 # train_eps fill
    W1 = jax.random.uniform(k1, (R, F, H), jnp.float32, -1.0, 1.0) / np.sqrt(F)
    b1 = jax.random.uniform(k2, (R, H), jnp.float32, -1.0, 1.0) / np.sqrt(F)
    Wf = jax.random.uniform(k3, (R * H, O), jnp.float32, -1.0, 1.0) / np.sqrt(R * H)
    bf = jax.random.uniform(k4, (O,), jnp.float32, -1.0, 1.0) / np.sqrt(R * H)

    out = sin_conv_forward(x, edge_index, edge_type, eps, W1, b1, Wf, bf, R)
    out = jax.block_until_ready(out)

    ref = sin_conv_reference(x, edge_index, edge_type, eps, W1, b1, Wf, bf, R)
    # Kernel uses int8 A (exact small counts) and bf16 matmul operands with f32
    # accumulation; tolerance loosened vs. the pure-f32 reference accordingly.
    np.testing.assert_allclose(np.asarray(out), np.asarray(ref),
                               rtol=5e-2, atol=5e-2)
    print("KERNEL_OK")
</pallas_src>

<mosaic_0001>
module attributes {stable_mosaic.version = 11 : i64} {
  func.func @_sin_conv_kernel(%arg0: i32, %arg1: memref<3xf32, #tpu.memory_space<smem>>, %arg2: memref<96x32xi8, #tpu.memory_space<vmem>>, %arg3: memref<32x128xbf16, #tpu.memory_space<vmem>>, %arg4: memref<3x128x128xbf16, #tpu.memory_space<vmem>>, %arg5: memref<3x1x128xf32, #tpu.memory_space<vmem>>, %arg6: memref<384x128xbf16, #tpu.memory_space<vmem>>, %arg7: memref<1x128xf32, #tpu.memory_space<vmem>>, %arg8: memref<32x128xf32, #tpu.memory_space<vmem>>) attributes {dimension_semantics = [#tpu.dimension_semantics<parallel>], iteration_bounds = array<i64: 1>, scalar_prefetch = 0 : i64, scratch_operands = 0 : i64, tpu.core_type = #tpu.core_type<tc>, window_params = [{transform_indices = @transform_0, window_bounds = array<i64: 3>}, {transform_indices = @transform_1, window_bounds = array<i64: 96, 32>}, {pipeline_mode = #tpu.pipeline_mode<synchronous>, transform_indices = @transform_2, window_bounds = array<i64: 32, 128>}, {pipeline_mode = #tpu.pipeline_mode<synchronous>, transform_indices = @transform_3, window_bounds = array<i64: 3, 128, 128>}, {pipeline_mode = #tpu.pipeline_mode<synchronous>, transform_indices = @transform_4, window_bounds = array<i64: 3, 1, 128>}, {pipeline_mode = #tpu.pipeline_mode<synchronous>, transform_indices = @transform_5, window_bounds = array<i64: 384, 128>}, {pipeline_mode = #tpu.pipeline_mode<synchronous>, transform_indices = @transform_6, window_bounds = array<i64: 1, 128>}, {transform_indices = @transform_7, window_bounds = array<i64: 32, 128>}]} {
    %c0 = arith.constant 0 : index
    %c0_0 = arith.constant 0 : index
    %0 = vector.load %arg3[%c0, %c0_0] : memref<32x128xbf16, #tpu.memory_space<vmem>>, vector<32x128xbf16>
    %c32_i32 = arith.constant 32 : i32
    %1 = arith.muli %arg0, %c32_i32 : i32
    %2 = tpu.assume_multiple %1, 32 : i32
    %3 = arith.index_cast %2 : i32 to index
    %c0_1 = arith.constant 0 : index
    %4 = vector.load %arg3[%3, %c0_1] : memref<32x128xbf16, #tpu.memory_space<vmem>>, vector<32x128xbf16>
    %5 = arith.extf %4 : vector<32x128xbf16> to vector<32x128xf32>
    %c0_2 = arith.constant 0 : index
    %c0_3 = arith.constant 0 : index
    %6 = vector.load %arg2[%c0_2, %c0_3] : memref<96x32xi8, #tpu.memory_space<vmem>>, vector<96x32xi8>
    %7 = arith.sitofp %6 : vector<96x32xi8> to vector<96x32xbf16>
    %cst = arith.constant dense<0.000000e+00> : vector<96x128xf32>
    %8 = tpu.matmul %7, %0, %cst {dimension_numbers = #tpu.dot_dimension_numbers<[1], [0], [0], [1], [0, 0, 1, 1], [], []>} : vector<96x32xbf16>, vector<32x128xbf16>, vector<96x128xf32> -> vector<96x128xf32>
    %9 = vector.extract_strided_slice %8 {offsets = [0, 0], sizes = [32, 128], strides = [1, 1]} : vector<96x128xf32> to vector<32x128xf32>
    %c0_4 = arith.constant 0 : index
    %10 = memref.load %arg1[%c0_4] : memref<3xf32, #tpu.memory_space<smem>>
    %cst_5 = arith.constant 1.000000e+00 : f32
    %11 = arith.addf %cst_5, %10 : f32
    %12 = vector.broadcast %11 : f32 to vector<32x128xf32>
    %13 = arith.mulf %12, %5 : vector<32x128xf32>
    %14 = arith.addf %9, %13 : vector<32x128xf32>
    %15 = arith.truncf %14 : vector<32x128xf32> to vector<32x128xbf16>
    %c0_6 = arith.constant 0 : index
    %c0_7 = arith.constant 0 : index
    %c0_8 = arith.constant 0 : index
    %16 = vector.load %arg4[%c0_6, %c0_7, %c0_8] : memref<3x128x128xbf16, #tpu.memory_space<vmem>>, vector<1x128x128xbf16>
    %17 = vector.shape_cast %16 : vector<1x128x128xbf16> to vector<128x128xbf16>
    %cst_9 = arith.constant dense<0.000000e+00> : vector<32x128xf32>
    %18 = tpu.matmul %15, %17, %cst_9 {dimension_numbers = #tpu.dot_dimension_numbers<[1], [0], [0], [1], [0, 0, 1, 1], [], []>} : vector<32x128xbf16>, vector<128x128xbf16>, vector<32x128xf32> -> vector<32x128xf32>
    %c0_10 = arith.constant 0 : index
    %c0_11 = arith.constant 0 : index
    %c0_12 = arith.constant 0 : index
    %19 = vector.load %arg5[%c0_10, %c0_11, %c0_12] : memref<3x1x128xf32, #tpu.memory_space<vmem>>, vector<1x1x128xf32>
    %20 = vector.shape_cast %19 : vector<1x1x128xf32> to vector<1x128xf32>
    %21 = vector.broadcast %20 : vector<1x128xf32> to vector<32x128xf32>
    %22 = arith.addf %18, %21 : vector<32x128xf32>
    %cst_13 = arith.constant 0.000000e+00 : f32
    %23 = vector.broadcast %cst_13 : f32 to vector<32x128xf32>
    %24 = arith.maximumf %22, %23 : vector<32x128xf32>
    %25 = arith.truncf %24 : vector<32x128xf32> to vector<32x128xbf16>
    %26 = vector.extract_strided_slice %8 {offsets = [32, 0], sizes = [32, 128], strides = [1, 1]} : vector<96x128xf32> to vector<32x128xf32>
    %c1 = arith.constant 1 : index
    %27 = memref.load %arg1[%c1] : memref<3xf32, #tpu.memory_space<smem>>
    %cst_14 = arith.constant 1.000000e+00 : f32
    %28 = arith.addf %cst_14, %27 : f32
    %29 = vector.broadcast %28 : f32 to vector<32x128xf32>
    %30 = arith.mulf %29, %5 : vector<32x128xf32>
    %31 = arith.addf %26, %30 : vector<32x128xf32>
    %32 = arith.truncf %31 : vector<32x128xf32> to vector<32x128xbf16>
    %c1_15 = arith.constant 1 : index
    %c0_16 = arith.constant 0 : index
    %c0_17 = arith.constant 0 : index
    %33 = vector.load %arg4[%c1_15, %c0_16, %c0_17] : memref<3x128x128xbf16, #tpu.memory_space<vmem>>, vector<1x128x128xbf16>
    %34 = vector.shape_cast %33 : vector<1x128x128xbf16> to vector<128x128xbf16>
    %cst_18 = arith.constant dense<0.000000e+00> : vector<32x128xf32>
    %35 = tpu.matmul %32, %34, %cst_18 {dimension_numbers = #tpu.dot_dimension_numbers<[1], [0], [0], [1], [0, 0, 1, 1], [], []>} : vector<32x128xbf16>, vector<128x128xbf16>, vector<32x128xf32> -> vector<32x128xf32>
    %c1_19 = arith.constant 1 : index
    %c0_20 = arith.constant 0 : index
    %c0_21 = arith.constant 0 : index
    %36 = vector.load %arg5[%c1_19, %c0_20, %c0_21] : memref<3x1x128xf32, #tpu.memory_space<vmem>>, vector<1x1x128xf32>
    %37 = vector.shape_cast %36 : vector<1x1x128xf32> to vector<1x128xf32>
    %38 = vector.broadcast %37 : vector<1x128xf32> to vector<32x128xf32>
    %39 = arith.addf %35, %38 : vector<32x128xf32>
    %cst_22 = arith.constant 0.000000e+00 : f32
    %40 = vector.broadcast %cst_22 : f32 to vector<32x128xf32>
    %41 = arith.maximumf %39, %40 : vector<32x128xf32>
    %42 = arith.truncf %41 : vector<32x128xf32> to vector<32x128xbf16>
    %43 = vector.extract_strided_slice %8 {offsets = [64, 0], sizes = [32, 128], strides = [1, 1]} : vector<96x128xf32> to vector<32x128xf32>
    %c2 = arith.constant 2 : index
    %44 = memref.load %arg1[%c2] : memref<3xf32, #tpu.memory_space<smem>>
    %cst_23 = arith.constant 1.000000e+00 : f32
    %45 = arith.addf %cst_23, %44 : f32
    %46 = vector.broadcast %45 : f32 to vector<32x128xf32>
    %47 = arith.mulf %46, %5 : vector<32x128xf32>
    %48 = arith.addf %43, %47 : vector<32x128xf32>
    %49 = arith.truncf %48 : vector<32x128xf32> to vector<32x128xbf16>
    %c2_24 = arith.constant 2 : index
    %c0_25 = arith.constant 0 : index
    %c0_26 = arith.constant 0 : index
    %50 = vector.load %arg4[%c2_24, %c0_25, %c0_26] : memref<3x128x128xbf16, #tpu.memory_space<vmem>>, vector<1x128x128xbf16>
    %51 = vector.shape_cast %50 : vector<1x128x128xbf16> to vector<128x128xbf16>
    %cst_27 = arith.constant dense<0.000000e+00> : vector<32x128xf32>
    %52 = tpu.matmul %49, %51, %cst_27 {dimension_numbers = #tpu.dot_dimension_numbers<[1], [0], [0], [1], [0, 0, 1, 1], [], []>} : vector<32x128xbf16>, vector<128x128xbf16>, vector<32x128xf32> -> vector<32x128xf32>
    %c2_28 = arith.constant 2 : index
    %c0_29 = arith.constant 0 : index
    %c0_30 = arith.constant 0 : index
    %53 = vector.load %arg5[%c2_28, %c0_29, %c0_30] : memref<3x1x128xf32, #tpu.memory_space<vmem>>, vector<1x1x128xf32>
    %54 = vector.shape_cast %53 : vector<1x1x128xf32> to vector<1x128xf32>
    %55 = vector.broadcast %54 : vector<1x128xf32> to vector<32x128xf32>
    %56 = arith.addf %52, %55 : vector<32x128xf32>
    %cst_31 = arith.constant 0.000000e+00 : f32
    %57 = vector.broadcast %cst_31 : f32 to vector<32x128xf32>
    %58 = arith.maximumf %56, %57 : vector<32x128xf32>
    %59 = arith.truncf %58 : vector<32x128xf32> to vector<32x128xbf16>
    %60 = tpu.concatenate %25, %42, %59 in 1 : vector<32x128xbf16>, vector<32x128xbf16>, vector<32x128xbf16> -> vector<32x384xbf16>
    %c0_32 = arith.constant 0 : index
    %c0_33 = arith.constant 0 : index
    %61 = vector.load %arg6[%c0_32, %c0_33] : memref<384x128xbf16, #tpu.memory_space<vmem>>, vector<384x128xbf16>
    %cst_34 = arith.constant dense<0.000000e+00> : vector<32x128xf32>
    %62 = tpu.matmul %60, %61, %cst_34 {dimension_numbers = #tpu.dot_dimension_numbers<[1], [0], [0], [1], [0, 0, 1, 1], [], []>} : vector<32x384xbf16>, vector<384x128xbf16>, vector<32x128xf32> -> vector<32x128xf32>
    %c0_35 = arith.constant 0 : index
    %c0_36 = arith.constant 0 : index
    %63 = vector.load %arg7[%c0_35, %c0_36] : memref<1x128xf32, #tpu.memory_space<vmem>>, vector<1x128xf32>
    %64 = vector.broadcast %63 : vector<1x128xf32> to vector<32x128xf32>
    %65 = arith.addf %62, %64 : vector<32x128xf32>
    %cst_37 = arith.constant 0.000000e+00 : f32
    %66 = vector.broadcast %cst_37 : f32 to vector<32x128xf32>
    %67 = arith.maximumf %65, %66 : vector<32x128xf32>
    %c0_38 = arith.constant 0 : index
    %c0_39 = arith.constant 0 : index
    %68 = vector.load %arg8[%c0_38, %c0_39] : memref<32x128xf32, #tpu.memory_space<vmem>>, vector<32x128xf32>
    tpu.vector_store %arg8[%c0_38, %c0_39], %67 {strides = array<i32>} : memref<32x128xf32, #tpu.memory_space<vmem>>, vector<32x128xf32>,
    return
  }
  func.func @transform_0(%arg0: i32) -> i32 {
    %c0_i32 = arith.constant 0 : i32
    %c0_i32_0 = arith.constant 0 : i32
    return %c0_i32 : i32
  }
  func.func @transform_1(%arg0: i32) -> (i32, i32) {
    %c0_i32 = arith.constant 0 : i32
    %c0_i32_0 = arith.constant 0 : i32
    return %arg0, %c0_i32 : i32, i32
  }
  func.func @transform_2(%arg0: i32) -> (i32, i32) {
    %c0_i32 = arith.constant 0 : i32
    %c0_i32_0 = arith.constant 0 : i32
    %c0_i32_1 = arith.constant 0 : i32
    return %c0_i32, %c0_i32_0 : i32, i32
  }
  func.func @transform_3(%arg0: i32) -> (i32, i32, i32) {
    %c0_i32 = arith.constant 0 : i32
    %c0_i32_0 = arith.constant 0 : i32
    %c0_i32_1 = arith.constant 0 : i32
    %c0_i32_2 = arith.constant 0 : i32
    return %c0_i32, %c0_i32_0, %c0_i32_1 : i32, i32, i32
  }
  func.func @transform_4(%arg0: i32) -> (i32, i32, i32) {
    %c0_i32 = arith.constant 0 : i32
    %c0_i32_0 = arith.constant 0 : i32
    %c0_i32_1 = arith.constant 0 : i32
    %c0_i32_2 = arith.constant 0 : i32
    return %c0_i32, %c0_i32_0, %c0_i32_1 : i32, i32, i32
  }
  func.func @transform_5(%arg0: i32) -> (i32, i32) {
    %c0_i32 = arith.constant 0 : i32
    %c0_i32_0 = arith.constant 0 : i32
    %c0_i32_1 = arith.constant 0 : i32
    return %c0_i32, %c0_i32_0 : i32, i32
  }
  func.func @transform_6(%arg0: i32) -> (i32, i32) {
    %c0_i32 = arith.constant 0 : i32
    %c0_i32_0 = arith.constant 0 : i32
    %c0_i32_1 = arith.constant 0 : i32
    return %c0_i32, %c0_i32_0 : i32, i32
  }
  func.func @transform_7(%arg0: i32) -> (i32, i32) {
    %c0_i32 = arith.constant 0 : i32
    %c0_i32_0 = arith.constant 0 : i32
    return %arg0, %c0_i32 : i32, i32
  }
}

module attributes {stable_mosaic.version = 11 : i64} {
  func.func @_sin_conv_kernel(%arg0: i32, %arg1: memref<3xf32, #tpu.memory_space<smem>>, %arg2: memref<96x32xi8, #tpu.memory_space<vmem>>, %arg3: memref<32x128xbf16, #tpu.memory_space<vmem>>, %arg4: memref<3x128x128xbf16, #tpu.memory_space<vmem>>, %arg5: memref<3x1x128xf32, #tpu.memory_space<vmem>>, %arg6: memref<384x128xbf16, #tpu.memory_space<vmem>>, %arg7: memref<1x128xf32, #tpu.memory_space<vmem>>, %arg8: memref<32x128xf32, #tpu.memory_space<vmem>>) attributes {dimension_semantics = [#tpu.dimension_semantics<parallel>], iteration_bounds = array<i64: 1>, scalar_prefetch = 0 : i64, scratch_operands = 0 : i64, tpu.core_type = #tpu.core_type<tc>, window_params = [{transform_indices = @transform_0, window_bounds = array<i64: 3>}, {transform_indices = @transform_1, window_bounds = array<i64: 96, 32>}, {pipeline_mode = #tpu.pipeline_mode<synchronous>, transform_indices = @transform_2, window_bounds = array<i64: 32, 128>}, {pipeline_mode = #tpu.pipeline_mode<synchronous>, transform_indices = @transform_3, window_bounds = array<i64: 3, 128, 128>}, {pipeline_mode = #tpu.pipeline_mode<synchronous>, transform_indices = @transform_4, window_bounds = array<i64: 3, 1, 128>}, {pipeline_mode = #tpu.pipeline_mode<synchronous>, transform_indices = @transform_5, window_bounds = array<i64: 384, 128>}, {pipeline_mode = #tpu.pipeline_mode<synchronous>, transform_indices = @transform_6, window_bounds = array<i64: 1, 128>}, {transform_indices = @transform_7, window_bounds = array<i64: 32, 128>}]} {
    %c0 = arith.constant 0 : index
    %c0_0 = arith.constant 0 : index
    %0 = vector.load %arg3[%c0, %c0_0] : memref<32x128xbf16, #tpu.memory_space<vmem>>, vector<32x128xbf16>
    %c32_i32 = arith.constant 32 : i32
    %1 = arith.muli %arg0, %c32_i32 : i32
    %2 = tpu.assume_multiple %1, 32 : i32
    %3 = arith.index_cast %2 : i32 to index
    %c0_1 = arith.constant 0 : index
    %4 = vector.load %arg3[%3, %c0_1] : memref<32x128xbf16, #tpu.memory_space<vmem>>, vector<32x128xbf16>
    %5 = arith.extf %4 : vector<32x128xbf16> to vector<32x128xf32>
    %c0_2 = arith.constant 0 : index
    %c0_3 = arith.constant 0 : index
    %6 = vector.load %arg2[%c0_2, %c0_3] : memref<96x32xi8, #tpu.memory_space<vmem>>, vector<96x32xi8>
    %7 = arith.sitofp %6 : vector<96x32xi8> to vector<96x32xbf16>
    %cst = arith.constant dense<0.000000e+00> : vector<96x128xf32>
    %8 = tpu.matmul %7, %0, %cst {dimension_numbers = #tpu.dot_dimension_numbers<[1], [0], [0], [1], [0, 0, 1, 1], [], []>} : vector<96x32xbf16>, vector<32x128xbf16>, vector<96x128xf32> -> vector<96x128xf32>
    %9 = vector.extract_strided_slice %8 {offsets = [0, 0], sizes = [32, 128], strides = [1, 1]} : vector<96x128xf32> to vector<32x128xf32>
    %c0_4 = arith.constant 0 : index
    %10 = memref.load %arg1[%c0_4] : memref<3xf32, #tpu.memory_space<smem>>
    %cst_5 = arith.constant 1.000000e+00 : f32
    %11 = arith.addf %cst_5, %10 : f32
    %12 = vector.broadcast %11 : f32 to vector<32x128xf32>
    %13 = arith.mulf %12, %5 : vector<32x128xf32>
    %14 = arith.addf %9, %13 : vector<32x128xf32>
    %15 = arith.truncf %14 : vector<32x128xf32> to vector<32x128xbf16>
    %c0_6 = arith.constant 0 : index
    %c0_7 = arith.constant 0 : index
    %c0_8 = arith.constant 0 : index
    %16 = vector.load %arg4[%c0_6, %c0_7, %c0_8] : memref<3x128x128xbf16, #tpu.memory_space<vmem>>, vector<1x128x128xbf16>
    %17 = vector.shape_cast %16 : vector<1x128x128xbf16> to vector<128x128xbf16>
    %cst_9 = arith.constant dense<0.000000e+00> : vector<32x128xf32>
    %18 = tpu.matmul %15, %17, %cst_9 {dimension_numbers = #tpu.dot_dimension_numbers<[1], [0], [0], [1], [0, 0, 1, 1], [], []>} : vector<32x128xbf16>, vector<128x128xbf16>, vector<32x128xf32> -> vector<32x128xf32>
    %c0_10 = arith.constant 0 : index
    %c0_11 = arith.constant 0 : index
    %c0_12 = arith.constant 0 : index
    %19 = vector.load %arg5[%c0_10, %c0_11, %c0_12] : memref<3x1x128xf32, #tpu.memory_space<vmem>>, vector<1x1x128xf32>
    %20 = vector.shape_cast %19 : vector<1x1x128xf32> to vector<1x128xf32>
    %21 = vector.broadcast %20 : vector<1x128xf32> to vector<32x128xf32>
    %22 = arith.addf %18, %21 : vector<32x128xf32>
    %cst_13 = arith.constant 0.000000e+00 : f32
    %23 = vector.broadcast %cst_13 : f32 to vector<32x128xf32>
    %24 = arith.maximumf %22, %23 : vector<32x128xf32>
    %25 = arith.truncf %24 : vector<32x128xf32> to vector<32x128xbf16>
    %26 = vector.extract_strided_slice %8 {offsets = [32, 0], sizes = [32, 128], strides = [1, 1]} : vector<96x128xf32> to vector<32x128xf32>
    %c1 = arith.constant 1 : index
    %27 = memref.load %arg1[%c1] : memref<3xf32, #tpu.memory_space<smem>>
    %cst_14 = arith.constant 1.000000e+00 : f32
    %28 = arith.addf %cst_14, %27 : f32
    %29 = vector.broadcast %28 : f32 to vector<32x128xf32>
    %30 = arith.mulf %29, %5 : vector<32x128xf32>
    %31 = arith.addf %26, %30 : vector<32x128xf32>
    %32 = arith.truncf %31 : vector<32x128xf32> to vector<32x128xbf16>
    %c1_15 = arith.constant 1 : index
    %c0_16 = arith.constant 0 : index
    %c0_17 = arith.constant 0 : index
    %33 = vector.load %arg4[%c1_15, %c0_16, %c0_17] : memref<3x128x128xbf16, #tpu.memory_space<vmem>>, vector<1x128x128xbf16>
    %34 = vector.shape_cast %33 : vector<1x128x128xbf16> to vector<128x128xbf16>
    %cst_18 = arith.constant dense<0.000000e+00> : vector<32x128xf32>
    %35 = tpu.matmul %32, %34, %cst_18 {dimension_numbers = #tpu.dot_dimension_numbers<[1], [0], [0], [1], [0, 0, 1, 1], [], []>} : vector<32x128xbf16>, vector<128x128xbf16>, vector<32x128xf32> -> vector<32x128xf32>
    %c1_19 = arith.constant 1 : index
    %c0_20 = arith.constant 0 : index
    %c0_21 = arith.constant 0 : index
    %36 = vector.load %arg5[%c1_19, %c0_20, %c0_21] : memref<3x1x128xf32, #tpu.memory_space<vmem>>, vector<1x1x128xf32>
    %37 = vector.shape_cast %36 : vector<1x1x128xf32> to vector<1x128xf32>
    %38 = vector.broadcast %37 : vector<1x128xf32> to vector<32x128xf32>
    %39 = arith.addf %35, %38 : vector<32x128xf32>
    %cst_22 = arith.constant 0.000000e+00 : f32
    %40 = vector.broadcast %cst_22 : f32 to vector<32x128xf32>
    %41 = arith.maximumf %39, %40 : vector<32x128xf32>
    %42 = arith.truncf %41 : vector<32x128xf32> to vector<32x128xbf16>
    %43 = vector.extract_strided_slice %8 {offsets = [64, 0], sizes = [32, 128], strides = [1, 1]} : vector<96x128xf32> to vector<32x128xf32>
    %c2 = arith.constant 2 : index
    %44 = memref.load %arg1[%c2] : memref<3xf32, #tpu.memory_space<smem>>
    %cst_23 = arith.constant 1.000000e+00 : f32
    %45 = arith.addf %cst_23, %44 : f32
    %46 = vector.broadcast %45 : f32 to vector<32x128xf32>
    %47 = arith.mulf %46, %5 : vector<32x128xf32>
    %48 = arith.addf %43, %47 : vector<32x128xf32>
    %49 = arith.truncf %48 : vector<32x128xf32> to vector<32x128xbf16>
    %c2_24 = arith.constant 2 : index
    %c0_25 = arith.constant 0 : index
    %c0_26 = arith.constant 0 : index
    %50 = vector.load %arg4[%c2_24, %c0_25, %c0_26] : memref<3x128x128xbf16, #tpu.memory_space<vmem>>, vector<1x128x128xbf16>
    %51 = vector.shape_cast %50 : vector<1x128x128xbf16> to vector<128x128xbf16>
    %cst_27 = arith.constant dense<0.000000e+00> : vector<32x128xf32>
    %52 = tpu.matmul %49, %51, %cst_27 {dimension_numbers = #tpu.dot_dimension_numbers<[1], [0], [0], [1], [0, 0, 1, 1], [], []>} : vector<32x128xbf16>, vector<128x128xbf16>, vector<32x128xf32> -> vector<32x128xf32>
    %c2_28 = arith.constant 2 : index
    %c0_29 = arith.constant 0 : index
    %c0_30 = arith.constant 0 : index
    %53 = vector.load %arg5[%c2_28, %c0_29, %c0_30] : memref<3x1x128xf32, #tpu.memory_space<vmem>>, vector<1x1x128xf32>
    %54 = vector.shape_cast %53 : vector<1x1x128xf32> to vector<1x128xf32>
    %55 = vector.broadcast %54 : vector<1x128xf32> to vector<32x128xf32>
    %56 = arith.addf %52, %55 : vector<32x128xf32>
    %cst_31 = arith.constant 0.000000e+00 : f32
    %57 = vector.broadcast %cst_31 : f32 to vector<32x128xf32>
    %58 = arith.maximumf %56, %57 : vector<32x128xf32>
    %59 = arith.truncf %58 : vector<32x128xf32> to vector<32x128xbf16>
    %60 = tpu.concatenate %25, %42, %59 in 1 : vector<32x128xbf16>, vector<32x128xbf16>, vector<32x128xbf16> -> vector<32x384xbf16>
    %c0_32 = arith.constant 0 : index
    %c0_33 = arith.constant 0 : index
    %61 = vector.load %arg6[%c0_32, %c0_33] : memref<384x128xbf16, #tpu.memory_space<vmem>>, vector<384x128xbf16>
    %cst_34 = arith.constant dense<0.000000e+00> : vector<32x128xf32>
    %62 = tpu.matmul %60, %61, %cst_34 {dimension_numbers = #tpu.dot_dimension_numbers<[1], [0], [0], [1], [0, 0, 1, 1], [], []>} : vector<32x384xbf16>, vector<384x128xbf16>, vector<32x128xf32> -> vector<32x128xf32>
    %c0_35 = arith.constant 0 : index
    %c0_36 = arith.constant 0 : index
    %63 = vector.load %arg7[%c0_35, %c0_36] : memref<1x128xf32, #tpu.memory_space<vmem>>, vector<1x128xf32>
    %64 = vector.broadcast %63 : vector<1x128xf32> to vector<32x128xf32>
    %65 = arith.addf %62, %64 : vector<32x128xf32>
    %cst_37 = arith.constant 0.000000e+00 : f32
    %66 = vector.broadcast %cst_37 : f32 to vector<32x128xf32>
    %67 = arith.maximumf %65, %66 : vector<32x128xf32>
    %c0_38 = arith.constant 0 : index
    %c0_39 = arith.constant 0 : index
    %68 = vector.load %arg8[%c0_38, %c0_39] : memref<32x128xf32, #tpu.memory_space<vmem>>, vector<32x128xf32>
    tpu.vector_store %arg8[%c0_38, %c0_39], %67 {strides = array<i32>} : memref<32x128xf32, #tpu.memory_space<vmem>>, vector<32x128xf32>,
    return
  }
  func.func @transform_0(%arg0: i32) -> i32 {
    %c0_i32 = arith.constant 0 : i32
    %c0_i32_0 = arith.constant 0 : i32
    return %c0_i32 : i32
  }
  func.func @transform_1(%arg0: i32) -> (i32, i32) {
    %c0_i32 = arith.constant 0 : i32
    %c0_i32_0 = arith.constant 0 : i32
    return %arg0, %c0_i32 : i32, i32
  }
  func.func @transform_2(%arg0: i32) -> (i32, i32) {
    %c0_i32 = arith.constant 0 : i32
    %c0_i32_0 = arith.constant 0 : i32
    %c0_i32_1 = arith.constant 0 : i32
    return %c0_i32, %c0_i32_0 : i32, i32
  }
  func.func @transform_3(%arg0: i32) -> (i32, i32, i32) {
    %c0_i32 = arith.constant 0 : i32
    %c0_i32_0 = arith.constant 0 : i32
    %c0_i32_1 = arith.constant 0 : i32
    %c0_i32_2 = arith.constant 0 : i32
    return %c0_i32, %c0_i32_0, %c0_i32_1 : i32, i32, i32
  }
  func.func @transform_4(%arg0: i32) -> (i32, i32, i32) {
    %c0_i32 = arith.constant 0 : i32
    %c0_i32_0 = arith.constant 0 : i32
    %c0_i32_1 = arith.constant 0 : i32
    %c0_i32_2 = arith.constant 0 : i32
    return %c0_i32, %c0_i32_0, %c0_i32_1 : i32, i32, i32
  }
  func.func @transform_5(%arg0: i32) -> (i32, i32) {
    %c0_i32 = arith.constant 0 : i32
    %c0_i32_0 = arith.constant 0 : i32
    %c0_i32_1 = arith.constant 0 : i32
    return %c0_i32, %c0_i32_0 : i32, i32
  }
  func.func @transform_6(%arg0: i32) -> (i32, i32) {
    %c0_i32 = arith.constant 0 : i32
    %c0_i32_0 = arith.constant 0 : i32
    %c0_i32_1 = arith.constant 0 : i32
    return %c0_i32, %c0_i32_0 : i32, i32
  }
  func.func @transform_7(%arg0: i32) -> (i32, i32) {
    %c0_i32 = arith.constant 0 : i32
    %c0_i32_0 = arith.constant 0 : i32
    return %arg0, %c0_i32 : i32, i32
  }
}

</mosaic_0001>

<bundles_post_ra>
// kernel: tpu_custom_call.1
= control target key start
LH: loop header
LB: loop body
LE: loop exit
PB: predicated region body
PF: predicated region fallthrough
CT: control target
= control target key end

     0   :  { %12 = vsyncpa [#allocation5], 0  ;;  %s1472_s0 = inlined_call_operand.vmem [shape: f32[3], index: 0, kind: input, shape index: {}]   ;;  %s1473_s1 = inlined_call_operand.vmem [shape: s8[96,32], index: 1, kind: input, shape index: {}]   ;;  %s1474_s2 = inlined_call_operand.vmem [shape: bf16[32,128], index: 2, kind: input, shape index: {}]   ;;  %s1475_s3 = inlined_call_operand.hbm [shape: bf16[3,128,128], index: 3, kind: input, shape index: {}]   ;;  %s1476_s4 = inlined_call_operand.vmem [shape: f32[3,1,128], index: 4, kind: input, shape index: {}]   ;;  %s1477_s5 = inlined_call_operand.hbm [shape: bf16[384,128], index: 5, kind: input, shape index: {}]   ;;  %s1478_s6 = inlined_call_operand.vmem [shape: f32[1,128], index: 6, kind: input, shape index: {}]   ;;  %s1479_s7 = inlined_call_operand.hbm [shape: f32[32,128], index: 7, kind: output, shape index: {}]  }
   0x1   :  { %13 = vsyncpa [#allocation3], 0 }
   0x2   :  { %14 = vsyncpa [#allocation8], 0 }
   0x3   :  { %15 = vsyncpa [#allocation4], 0  ;;  %s22_s26 = sshll.u32 %s1472_s0, 4  ;;  %s23_s26 = int_to_ptr.vmem [resolvable:$true] %s22_s26 }
   0x4   :  { %s1257_s27 = scalar_lea.vmem %s23_s26, 16  ;;  %p1262_p1 = scmp.lt.s32.totalorder %s23_s26, %s23_s26 }
   0x5   :  { %p1258_p0 = scmp.ne.s32.totalorder %s23_s26, %s1257_s27  ;;  %p1263_p2 = scmp.lt.s32.totalorder %s1257_s27, %s1257_s27 }
   0x7   :  { %p1264_p3 = por %p1263_p2, %p1262_p1 }
   0x9   :  { %p1265_p4 = pnand %p1264_p3, %p1258_p0 }
   0xb   :  { %1268 = shalt.err (!%p1265_p4)
}
   0xc   :  { %s1343_s28 = smov [#allocation2]   ;;  %s1344_s29 = smov [#allocation6]  }
   0xd   :  { %25 = dma.vmem_to_smem %s23_s26, 16, %s1343_s28, [#allocation5]  }
   0xe   :  { %s35_s30 = sshll.u32 %s1344_s29, 4  ;;  %s1269_s10 = scalar_lea.hbm %s1475_s3, 3072  ;;  %s36_s30 = int_to_ptr.vmem [resolvable:$true] %s35_s30 }
   0xf   :  { %p1270_p5 = scmp.ne.s32.totalorder %s1475_s3, %s1269_s10  ;;  %p1273_p6 = scmp.lt.u32.totalorder %s1269_s10, %s1475_s3 }
  0x11   :  { %p1275_p7 = pnand %p1273_p6, %p1270_p5 }
  0x13   :  { %1278 = shalt.err (!%p1275_p7)
}
  0x14   :  { %s1279_s14 = scalar_lea.vmem %s36_s30, 3072  ;;  %p1284_p9 = scmp.lt.s32.totalorder %s36_s30, %s36_s30 }
  0x15   :  { %p1280_p8 = scmp.ne.s32.totalorder %s36_s30, %s1279_s14  ;;  %p1285_p10 = scmp.lt.s32.totalorder %s1279_s14, %s1279_s14 }
  0x17   :  { %p1286_p11 = por %p1285_p10, %p1284_p9 }
  0x19   :  { %p1287_p12 = pnand %p1286_p11, %p1280_p8 }
  0x1b   :  { %1290 = shalt.err (!%p1287_p12)
}
  0x1c   :  { %s1345_s15 = smov 64   ;;  %s1346_s16 = smov 4  }
  0x1d   :  { %41 = dma.hbm_to_vmem [thread:$0]  %s1475_s3, 3072, %s36_s30, [#allocation3], %s1345_s15, %s1345_s15, %s1346_s16  }
  0x1e   :  { %s1347_s19 = smov [#allocation7]   ;;  %s1291_s23 = scalar_lea.hbm %s1477_s5, 3072 }
  0x1f   :  { %s49_s20 = sshll.u32 %s1347_s19, 4  ;;  %p1292_p13 = scmp.ne.s32.totalorder %s1477_s5, %s1291_s23  ;;  %s50_s20 = int_to_ptr.vmem [resolvable:$true] %s49_s20 }
  0x20   :  { %p1295_p0 = scmp.lt.u32.totalorder %s1291_s23, %s1477_s5 }
  0x22   :  { %p1297_p1 = pnand %p1295_p0, %p1292_p13 }
  0x24   :  { %1300 = shalt.err (!%p1297_p1)
}
  0x25   :  { %s1301_s28 = scalar_lea.vmem %s50_s20, 3072  ;;  %p1306_p3 = scmp.lt.s32.totalorder %s50_s20, %s50_s20 }
  0x26   :  { %p1302_p2 = scmp.ne.s32.totalorder %s50_s20, %s1301_s28  ;;  %p1307_p4 = scmp.lt.s32.totalorder %s1301_s28, %s1301_s28 }
  0x28   :  { %p1308_p5 = por %p1307_p4, %p1306_p3 }
  0x2a   :  { %p1309_p6 = pnand %p1308_p5, %p1302_p2 }
  0x2c   :  { %1312 = shalt.err (!%p1309_p6)
}
  0x2d   :  { %55 = dma.hbm_to_vmem [thread:$0]  %s1477_s5, 3072, %s50_s20, [#allocation8], %s1345_s15, %s1345_s15, %s1346_s16  }
  0x2e   :  { %1335 = dma.done.wait [#allocation5], 16  }
  0x2f   :  { %1336 = vsyncadd [#allocation5], 4294967280 }
  0x30   :  { %1337 = dma.done.wait [#allocation3], 3072  }
  0x31   :  { %1338 = vsyncadd [#allocation3], 4294964224 }
  0x32   :  { %1339 = dma.done.wait [#allocation8], 3072  }
  0x33   :  { %1340 = vsyncadd [#allocation8], 4294964224 }
  0x34   :  { %67 = sfence }
  0x35   :  { %v1207_v0 = vld [vmem:[%s1474_s2] sm:$0xff]   ;;  %v1208_v1 = vld [vmem:[%s1474_s2 + $0x8] sm:$0xff]   ;;  %vm107_vm0 = vcmask 261120   ;;  %v1211_v10 = vld [vmem:[#allocation6 + $0x10] sm:$0xff]   ;;  %s971_s15 = sld [smem:[#allocation2 + $0x1]]  ;;  %s1445_s22 = sld [smem:[#allocation2 + $0x2]] }
  0x36   :  { %1103 = vmatprep.subr.bf16.mxu0 %v1207_v0  ;;  %v86_v2 = vld [vmem:[%s1473_s1] sm:$0xff]  ;;  %v87_v3 = vld [vmem:[%s1473_s1 + $0x8] sm:$0xff]  ;;  %v1213_v12 = vld [vmem:[#allocation6 + $0x18] sm:$0xff]   ;;  %s1348_s29 = smov [#allocation9]  }
  0x37   :  { %1104 = vmatpush3.bf16.msra.mxu0 %v1207_v0  ;;  %v89_v4 = vunpack.c.l.s8.bf16 %v86_v2  ;;  %v1209_v5 = vld [vmem:[#allocation6] sm:$0xff]   ;;  %v1210_v6 = vld [vmem:[#allocation6 + $0x8] sm:$0xff]   ;;  %v90_v7 = vunpack.c.h.s8.bf16 %v86_v2  ;;  %v91_v9 = vunpack.c.l.s8.bf16 %v87_v3  ;;  %v88_v13 = vld [vmem:[%s1473_s1 + $0x10] sm:$0xff]  ;;  %v92_v16 = vunpack.c.h.s8.bf16 %v87_v3  ;;  %s207_s1 = sld [smem:[#allocation2]]  ;;  %s938_s30 = sshll.u32 %s1348_s29, 4  ;;  %s939_s30 = int_to_ptr.vmem [resolvable:$true] %s938_s30 }
  0x38   :  { %1105 = vmatprep.subr.bf16.mxu0 %v1208_v1  ;;  %1119 = vmatprep.subr.bf16.mxu1 %v1209_v5  ;;  %v1212_v8 = vld [vmem:[#allocation6 + $0x40] sm:$0xff]   ;;  %v1214_v11 = vld [vmem:[#allocation6 + $0x48] sm:$0xff]   ;;  %v1216_v15 = vld [vmem:[#allocation6 + $0x50] sm:$0xff]   ;;  %v93_v17 = vunpack.c.l.s8.bf16 %v88_v13  ;;  %v94_v20 = vunpack.c.h.s8.bf16 %v88_v13  ;;  %p1318_p8 = scmp.lt.s32.totalorder %s939_s30, %s939_s30 }
  0x39   :  { %1107 = vmatprep.mubr.msk.bf16.mxu0 %vm107_vm0, %v89_v4  ;;  %1120 = vmatpush3.bf16.msra.mxu1 %v1209_v5  ;;  %v1215_v14 = vld [vmem:[#allocation6 + $0x20] sm:$0xff]   ;;  %v1218_v18 = vld [vmem:[#allocation6 + $0x58] sm:$0xff]   ;;  %v1217_v19 = vld [vmem:[#allocation6 + $0x28] sm:$0xff]  }
  0x3a   :  { %1121 = vmatprep.subr.bf16.mxu1 %v1210_v6  ;;  %v1219_v21 = vld [vmem:[#allocation6 + $0x30] sm:$0xff]   ;;  %v1220_v22 = vld [vmem:[#allocation6 + $0x60] sm:$0xff]   ;;  %v1221_v23 = vld [vmem:[#allocation6 + $0x38] sm:$0xff]  }
  0x3b   :  { %1106 = vmatpush3.bf16.msra.mxu0 %v1208_v1  ;;  %v1222_v24 = vld [vmem:[#allocation6 + $0x68] sm:$0xff]   ;;  %v1223_v25 = vld [vmem:[#allocation6 + $0x80] sm:$0xff]   ;;  %v1224_v26 = vld [vmem:[#allocation6 + $0x70] sm:$0xff]   ;;  %s347_s21 = sadd.f32 1.0, %s971_s15 }
  0x3c   :  { %1139 = vmatprep.subr.bf16.mxu0 %v1212_v8  ;;  %v1226_v27 = vld [vmem:[#allocation6 + $0x78] sm:$0xff]   ;;  %v1233_v28 = vld [vmem:[#allocation7 + $0x40] sm:$0xff]   ;;  %v1026_v29 = vld [vmem:[%s1474_s2 + $0x8] sm:$0xff]  }
  0x3d   :  { %1122 = vmatpush3.bf16.msra.mxu1 %v1210_v6  ;;  %s208_s18 = sadd.f32 1.0, %s207_s1  ;;  %v1019_v30 = vld [vmem:[%s1474_s2] sm:$0xff]   ;;  %v1024_v31 = vunpack.c.l.bf16 %v1026_v29  ;;  %v1025_v32 = vunpack.c.h.bf16 %v1026_v29  ;;  %v348_v43 = vstv %s347_s21  ;;  %v1225_v54 = vld [vmem:[#allocation6 + $0x88] sm:$0xff]   ;;  %v1227_v0 = vld [vmem:[#allocation6 + $0x90] sm:$0xff]  }
  0x3e   :  { %1108 = vmatmul.mubr.msk.bf16.vlgmr.msra.gmra.mrb[0].mxu0 %vm107_vm0, %v90_v7  ;;  %1123 = vmatprep.subr.bf16.mxu1 %v1211_v10  ;;  %v1020_v34 = vunpack.c.l.bf16 %v1019_v30  ;;  %v1021_v35 = vunpack.c.h.bf16 %v1019_v30  ;;  %s488_s2 = sadd.f32 1.0, %s1445_s22  ;;  %v1234_v6 = vld [vmem:[#allocation7] sm:$0xff]   ;;  %v1228_v7 = vld [vmem:[#allocation6 + $0x98] sm:$0xff]  }
  0x3f   :  { %1111 = vmatprep.mubr.msk.bf16.mxu0 %vm107_vm0, %v91_v9  ;;  %1140 = vmatpush3.bf16.msra.mxu0 %v1212_v8  ;;  %v209_v33 = vstv %s208_s18  ;;  %v351_v50 = vmul.f32 %v1024_v31, %v348_v43  ;;  %v352_v53 = vmul.f32 %v1025_v32, %v348_v43  ;;  %v1235_v9 = vld [vmem:[#allocation7 + $0x48] sm:$0xff]   ;;  %v1240_v29 = vld [vmem:[#allocation7 + $0x18] sm:$0xff]   ;;  %v1241_v30 = vld [vmem:[#allocation7 + $0x60] sm:$0xff]  }
  0x40   :  { %1141 = vmatprep.subr.bf16.mxu0 %v1214_v11  ;;  %v212_v36 = vmul.f32 %v1024_v31, %v209_v33  ;;  %v213_v37 = vmul.f32 %v1025_v32, %v209_v33  ;;  %v210_v39 = vmul.f32 %v1020_v34, %v209_v33  ;;  %v211_v40 = vmul.f32 %v1021_v35, %v209_v33  ;;  %v1244_v33 = vld [vmem:[#allocation7 + $0x28] sm:$0xff]  }
  0x41   :  { %1124 = vmatpush3.bf16.msra.mxu1 %v1211_v10  ;;  %v349_v52 = vmul.f32 %v1020_v34, %v348_v43  ;;  %v350_v56 = vmul.f32 %v1021_v35, %v348_v43  ;;  %v489_v61 = vstv %s488_s2  ;;  %v1254_v43 = vld [vmem:[#allocation7 + $0xa8] sm:$0xff]  }
  0x42   :  { %1125 = vmatprep.subr.bf16.mxu1 %v1213_v12  ;;  %v492_v3 = vmul.f32 %v1024_v31, %v489_v61  ;;  %v490_v5 = vmul.f32 %v1020_v34, %v489_v61  ;;  %v493_v8 = vmul.f32 %v1025_v32, %v489_v61  ;;  %v1242_v31 = vld [vmem:[#allocation7 + $0x20] sm:$0xff]   ;;  %v1243_v32 = vld [vmem:[#allocation7 + $0x68] sm:$0xff]  }
  0x43   :  { %1142 = vmatpush3.bf16.msra.mxu0 %v1214_v11  ;;  %v491_v11 = vmul.f32 %v1021_v35, %v489_v61  ;;  %v1245_v34 = vld [vmem:[#allocation7 + $0x80] sm:$0xff]   ;;  %v1246_v35 = vld [vmem:[#allocation7 + $0x70] sm:$0xff]  }
  0x44   :  { %1143 = vmatprep.subr.bf16.mxu0 %v1216_v15 }
  0x45   :  { %1126 = vmatpush3.bf16.msra.mxu1 %v1213_v12 }
  0x46   :  { %1112 = vmatmul.mubr.msk.bf16.gmra.mrb[4].mxu0 %vm107_vm0, %v92_v16  ;;  %1127 = vmatprep.subr.bf16.mxu1 %v1215_v14  ;;  %v1236_v16 = vld [vmem:[#allocation7 + $0x8] sm:$0xff]  }
  0x47   :  { %1115 = vmatprep.mubr.msk.bf16.mxu0 %vm107_vm0, %v93_v17  ;;  %1144 = vmatpush3.bf16.msra.mxu0 %v1216_v15  ;;  %v1229_v17 = vld [vmem:[#allocation6 + $0xa0] sm:$0xff]  }
  0x48   :  { %1145 = vmatprep.subr.bf16.mxu0 %v1218_v18 }
  0x49   :  { %1128 = vmatpush3.bf16.msra.mxu1 %v1215_v14 }
  0x4a   :  { %1129 = vmatprep.subr.bf16.mxu1 %v1217_v19 }
  0x4b   :  { %1146 = vmatpush3.bf16.msra.mxu0 %v1218_v18 }
  0x4c   :  { %1147 = vmatprep.subr.bf16.mxu0 %v1220_v22 }
  0x4d   :  { %1130 = vmatpush3.bf16.msra.mxu1 %v1217_v19 }
  0x4e   :  { %1116 = vmatmul.mubr.msk.bf16.gmra.mrb[8].mxu0 %vm107_vm0, %v94_v20  ;;  %1131 = vmatprep.subr.bf16.mxu1 %v1219_v21  ;;  %v1237_v20 = vld [vmem:[#allocation7 + $0x50] sm:$0xff]  }
  0x4f   :  { %1148 = vmatpush3.bf16.msra.mxu0 %v1220_v22 }
  0x50   :  { %1149 = vmatprep.subr.bf16.mxu0 %v1222_v24 }
  0x51   :  { %1132 = vmatpush3.bf16.msra.mxu1 %v1219_v21 }
  0x52   :  { %1133 = vmatprep.subr.bf16.mxu1 %v1221_v23 }
  0x53   :  { %1150 = vmatpush3.bf16.msra.mxu0 %v1222_v24  ;;  %v1238_v24 = vld [vmem:[#allocation7 + $0x10] sm:$0xff]  }
  0x54   :  { %1151 = vmatprep.subr.bf16.mxu0 %v1224_v26 }
  0x55   :  { %1134 = vmatpush3.bf16.msra.mxu1 %v1221_v23 }
  0x56   :  { %1159 = vmatprep.subr.bf16.mxu1 %v1223_v25 }
  0x57   :  { %1152 = vmatpush3.bf16.msra.mxu0 %v1224_v26  ;;  %v1239_v26 = vld [vmem:[#allocation7 + $0x58] sm:$0xff]  }
  0x58   :  { %1153 = vmatprep.subr.bf16.mxu0 %v1226_v27 }
  0x5b   :  { %1154 = vmatpush3.bf16.msra.mxu0 %v1226_v27  ;;  %v1231_v27 = vld [vmem:[#allocation6 + $0xb0] sm:$0xff]  }
  0x5c   :  { %1065 = vmatprep.subr.bf16.mxu0 %v1233_v28  ;;  %v1232_v28 = vld [vmem:[#allocation6 + $0xb8] sm:$0xff]  }
 0x111   :  { %v1109_v38 = vpop.f32.mrb[0].mxu0 }
 0x112   :  { %v160_v41 = vpop.f32.mrb[1].mxu0  ;;  %v216_v44 = vadd.f32 %v1109_v38, %v212_v36  ;;  %v1247_v36 = vld [vmem:[#allocation7 + $0x30] sm:$0xff]   ;;  %v1249_v38 = vld [vmem:[#allocation7 + $0x78] sm:$0xff]  }
 0x113   :  { %v1110_v42 = vpop.f32.mrb[2].mxu0  ;;  %v214_v47 = vadd.f32 %v210_v39, %v160_v41  ;;  %v1250_v39 = vld [vmem:[#allocation7 + $0x38] sm:$0xff]  }
 0x114   :  { %v217_v45 = vadd.f32 %v1110_v42, %v213_v37  ;;  %v163_v46 = vpop.f32.mrb[3].mxu0  ;;  %v1248_v37 = vld [vmem:[#allocation7 + $0x88] sm:$0xff]   ;;  %v1252_v41 = vld [vmem:[#allocation7 + $0x98] sm:$0xff]   ;;  %v1253_v42 = vld [vmem:[#allocation7 + $0xa0] sm:$0xff]  }
 0x115   :  { %v215_v48 = vadd.f32 %v211_v40, %v163_v46  ;;  %v1251_v40 = vld [vmem:[#allocation7 + $0x90] sm:$0xff]   ;;  %v962_v46 = vld [vmem:[%s1476_s4] ss:$0 sm:$0xff] }
 0x116   :  { %v219_v49 = vpack.c.bf16 %v217_v45, %v216_v44  ;;  %v1255_v44 = vld [vmem:[#allocation7 + $0xb0] sm:$0xff]   ;;  %v1256_v45 = vld [vmem:[#allocation7 + $0xb8] sm:$0xff]  }
 0x117   :  { %v218_v51 = vpack.c.bf16 %v215_v48, %v214_v47 }
 0x119   :  { %v1113_v55 = vpop.f32.mrb[4].mxu0  ;;  %1135 = vmatprep.mubr.bf16.mxu1 %v218_v51 }
 0x11a   :  { %v355_v57 = vadd.f32 %v1113_v55, %v351_v50  ;;  %v176_v58 = vpop.f32.mrb[5].mxu0  ;;  %1136 = vmatmul.mubr.bf16.vlgmr.msra.gmra.mrb[0].mxu1 %v219_v49 }
 0x11b   :  { %v353_v59 = vadd.f32 %v349_v52, %v176_v58  ;;  %1160 = vmatpush3.bf16.msra.mxu1 %v1223_v25  ;;  %v1114_v60 = vpop.f32.mrb[6].mxu0  ;;  %v1230_v25 = vld [vmem:[#allocation6 + $0xa8] sm:$0xff]  }
 0x11c   :  { %v356_v62 = vadd.f32 %v1114_v60, %v352_v53  ;;  %v179_v63 = vpop.f32.mrb[7].mxu0  ;;  %1161 = vmatprep.subr.bf16.mxu1 %v1225_v54  ;;  %v973_v60 = vld [vmem:[%s1476_s4 + $0x1] ss:$0 sm:$0xff] }
 0x11d   :  { %v354_v1 = vadd.f32 %v350_v56, %v179_v63 }
 0x11e   :  { %v358_v2 = vpack.c.bf16 %v356_v62, %v355_v57 }
 0x11f   :  { %v357_v4 = vpack.c.bf16 %v354_v1, %v353_v59  ;;  %1162 = vmatpush3.bf16.msra.mxu1 %v1225_v54 }
 0x120   :  { %1163 = vmatprep.subr.bf16.mxu1 %v1227_v0 }
 0x121   :  { %1155 = vmatprep.mubr.bf16.mxu0 %v357_v4  ;;  %v1117_v10 = vpop.f32.mrb[8].mxu0 }
 0x122   :  { %1156 = vmatmul.mubr.bf16.vlgmr.msra.gmra.mrb[12].mxu0 %v358_v2  ;;  %v496_v12 = vadd.f32 %v1117_v10, %v492_v3  ;;  %v192_v13 = vpop.f32.mrb[9].mxu0 }
 0x123   :  { %1164 = vmatpush3.bf16.msra.mxu1 %v1227_v0  ;;  %v494_v14 = vadd.f32 %v490_v5, %v192_v13  ;;  %v1118_v15 = vpop.f32.mrb[10].mxu0  ;;  %1066 = vmatpush3.bf16.msra.mxu0 %v1234_v6 }
 0x124   :  { %1165 = vmatprep.subr.bf16.mxu1 %v1228_v7  ;;  %v497_v18 = vadd.f32 %v1118_v15, %v493_v8  ;;  %v195_v19 = vpop.f32.mrb[11].mxu0  ;;  %1067 = vmatprep.subr.bf16.mxu0 %v1235_v9 }
 0x125   :  { %v495_v21 = vadd.f32 %v491_v11, %v195_v19 }
 0x126   :  { %v499_v22 = vpack.c.bf16 %v497_v18, %v496_v12  ;;  %v984_v12 = vld [vmem:[%s1476_s4 + $0x2] ss:$0 sm:$0xff] }
 0x127   :  { %1166 = vmatpush3.bf16.msra.mxu1 %v1228_v7  ;;  %v498_v23 = vpack.c.bf16 %v495_v21, %v494_v14  ;;  %1068 = vmatpush3.bf16.msra.mxu0 %v1236_v16 }
 0x128   :  { %1167 = vmatprep.subr.bf16.mxu1 %v1229_v17  ;;  %1069 = vmatprep.subr.bf16.mxu0 %v1237_v20 }
 0x129   :  { %1175 = vmatprep.mubr.bf16.mxu1 %v498_v23 }
 0x12b   :  { %1168 = vmatpush3.bf16.msra.mxu1 %v1229_v17  ;;  %1070 = vmatpush3.bf16.msra.mxu0 %v1238_v24 }
 0x12c   :  { %1169 = vmatprep.subr.bf16.mxu1 %v1230_v25  ;;  %1071 = vmatprep.subr.bf16.mxu0 %v1239_v26 }
 0x12f   :  { %1170 = vmatpush3.bf16.msra.mxu1 %v1230_v25  ;;  %1072 = vmatpush3.bf16.msra.mxu0 %v1240_v29 }
 0x130   :  { %1171 = vmatprep.subr.bf16.mxu1 %v1231_v27  ;;  %1073 = vmatprep.subr.bf16.mxu0 %v1241_v30 }
 0x133   :  { %1172 = vmatpush3.bf16.msra.mxu1 %v1231_v27  ;;  %1074 = vmatpush3.bf16.msra.mxu0 %v1242_v31 }
 0x134   :  { %1173 = vmatprep.subr.bf16.mxu1 %v1232_v28  ;;  %1075 = vmatprep.subr.bf16.mxu0 %v1243_v32 }
 0x137   :  { %1174 = vmatpush3.bf16.msra.mxu1 %v1232_v28  ;;  %1076 = vmatpush3.bf16.msra.mxu0 %v1244_v33 }
 0x138   :  { %1179 = vmatprep.subr.bf16.mxu1 %v1245_v34  ;;  %1077 = vmatprep.subr.bf16.mxu0 %v1246_v35 }
 0x13a   :  { %1176 = vmatmul.mubr.bf16.vlgmr.msra.gmra.mrb[4].mxu1 %v499_v22 }
 0x13b   :  { %1180 = vmatpush3.bf16.msra.mxu1 %v1245_v34  ;;  %1078 = vmatpush3.bf16.msra.mxu0 %v1247_v36 }
 0x13c   :  { %1181 = vmatprep.subr.bf16.mxu1 %v1248_v37  ;;  %1079 = vmatprep.subr.bf16.mxu0 %v1249_v38 }
 0x13f   :  { %1182 = vmatpush3.bf16.msra.mxu1 %v1248_v37  ;;  %1080 = vmatpush3.bf16.msra.mxu0 %v1250_v39  ;;  %v993_v39 = vld [vmem:[%s1478_s6] ss:$0 sm:$0xff]  ;;  %s1313_s6 = scalar_lea.vmem %s939_s30, 512 }
 0x140   :  { %1183 = vmatprep.subr.bf16.mxu1 %v1251_v40  ;;  %p1314_p7 = scmp.ne.s32.totalorder %s939_s30, %s1313_s6  ;;  %p1319_p9 = scmp.lt.s32.totalorder %s1313_s6, %s1313_s6 }
 0x142   :  { %p1320_p10 = por %p1319_p9, %p1318_p8 }
 0x143   :  { %1184 = vmatpush3.bf16.msra.mxu1 %v1251_v40 }
 0x144   :  { %1185 = vmatprep.subr.bf16.mxu1 %v1252_v41  ;;  %p1321_p11 = pnand %p1320_p10, %p1314_p7 }
 0x147   :  { %1186 = vmatpush3.bf16.msra.mxu1 %v1252_v41 }
 0x148   :  { %1187 = vmatprep.subr.bf16.mxu1 %v1253_v42 }
 0x14b   :  { %1188 = vmatpush3.bf16.msra.mxu1 %v1253_v42 }
 0x14c   :  { %1189 = vmatprep.subr.bf16.mxu1 %v1254_v43 }
 0x14f   :  { %1190 = vmatpush3.bf16.msra.mxu1 %v1254_v43 }
 0x150   :  { %1191 = vmatprep.subr.bf16.mxu1 %v1255_v44 }
 0x153   :  { %1192 = vmatpush3.bf16.msra.mxu1 %v1255_v44 }
 0x154   :  { %1193 = vmatprep.subr.bf16.mxu1 %v1256_v45 }
 0x157   :  { %1194 = vmatpush3.bf16.msra.mxu1 %v1256_v45 }
 0x1ed   :  { %v1137_v47 = vpop.f32.mrb[0].mxu1 }
 0x1ee   :  { %v334_v48 = vadd.f32 %v1137_v47, %v962_v46  ;;  %v325_v49 = vpop.f32.mrb[1].mxu1 }
 0x1ef   :  { %v326_v50 = vadd.f32 %v962_v46, %v325_v49  ;;  %v1138_v51 = vpop.f32.mrb[2].mxu1 }
 0x1f0   :  { %v337_v52 = vadd.f32 %v1138_v51, %v962_v46  ;;  %v328_v53 = vpop.f32.mrb[3].mxu1  ;;  %v342_v55 = vmax.f32 %v334_v48, 0.0 }
 0x1f1   :  { %v329_v54 = vadd.f32 %v962_v46, %v328_v53  ;;  %v340_v57 = vmax.f32 %v326_v50, 0.0 }
 0x1f2   :  { %v343_v56 = vmax.f32 %v337_v52, 0.0 }
 0x1f3   :  { %v341_v58 = vmax.f32 %v329_v54, 0.0 }
 0x1f4   :  { %v345_v59 = vpack.c.bf16 %v343_v56, %v342_v55 }
 0x1f5   :  { %v344_v61 = vpack.c.bf16 %v341_v58, %v340_v57  ;;  %v1157_v62 = vpop.f32.mrb[12].mxu0 }
 0x1f6   :  { %v475_v63 = vadd.f32 %v1157_v62, %v973_v60  ;;  %v466_v0 = vpop.f32.mrb[13].mxu0 }
 0x1f7   :  { %v467_v1 = vadd.f32 %v973_v60, %v466_v0  ;;  %v1158_v2 = vpop.f32.mrb[14].mxu0 }
 0x1f8   :  { %v483_v3 = vmax.f32 %v475_v63, 0.0  ;;  %v478_v4 = vadd.f32 %v1158_v2, %v973_v60  ;;  %v469_v5 = vpop.f32.mrb[15].mxu0 }
 0x1f9   :  { %v481_v6 = vmax.f32 %v467_v1, 0.0  ;;  %v470_v7 = vadd.f32 %v973_v60, %v469_v5 }
 0x1fa   :  { %v484_v8 = vmax.f32 %v478_v4, 0.0 }
 0x1fb   :  { %v482_v9 = vmax.f32 %v470_v7, 0.0 }
 0x1fc   :  { %v486_v10 = vpack.c.bf16 %v484_v8, %v483_v3 }
 0x1fd   :  { %v485_v11 = vpack.c.bf16 %v482_v9, %v481_v6 }
 0x1ff   :  { %859 = vmatprep.mubr.bf16.mxu0 %v485_v11 }
 0x200   :  { %860 = vmatmul.mubr.bf16.vlgmr.msra.gmra.mrb[16].mxu0 %v344_v61 }
 0x201   :  { %867 = vmatprep.mubr.bf16.mxu0 %v486_v10 }
 0x208   :  { %868 = vmatmul.mubr.bf16.gmra.mrb[20].mxu0 %v345_v59 }
 0x20d   :  { %v1177_v13 = vpop.f32.mrb[4].mxu1 }
 0x20e   :  { %v616_v14 = vadd.f32 %v1177_v13, %v984_v12  ;;  %v607_v15 = vpop.f32.mrb[5].mxu1 }
 0x20f   :  { %v608_v16 = vadd.f32 %v984_v12, %v607_v15  ;;  %v1178_v17 = vpop.f32.mrb[6].mxu1 }
 0x210   :  { %v619_v18 = vadd.f32 %v1178_v17, %v984_v12  ;;  %v610_v19 = vpop.f32.mrb[7].mxu1  ;;  %v624_v21 = vmax.f32 %v616_v14, 0.0 }
 0x211   :  { %v611_v20 = vadd.f32 %v984_v12, %v610_v19  ;;  %v622_v23 = vmax.f32 %v608_v16, 0.0 }
 0x212   :  { %v625_v22 = vmax.f32 %v619_v18, 0.0 }
 0x213   :  { %v623_v24 = vmax.f32 %v611_v20, 0.0 }
 0x214   :  { %v627_v25 = vpack.c.bf16 %v625_v22, %v624_v21 }
 0x215   :  { %v626_v26 = vpack.c.bf16 %v623_v24, %v622_v23 }
 0x217   :  { %1195 = vmatprep.mubr.bf16.mxu1 %v626_v26 }
 0x218   :  { %1196 = vmatmul.mubr.bf16.vlgmr.msra.gmra.mrb[8].mxu1 %v627_v25 }
 0x2d3   :  { %v1081_v27 = vpop.f32.mrb[16].mxu0 }
 0x2d4   :  { %v1082_v28 = vpop.f32.mrb[17].mxu0 }
 0x2d5   :  { %v1083_v29 = vadd.f32 %v1082_v28, %v1081_v27  ;;  %v1084_v30 = vpop.f32.mrb[18].mxu0 }
 0x2d6   :  { %v1085_v31 = vpop.f32.mrb[19].mxu0 }
 0x2d7   :  { %v1086_v32 = vadd.f32 %v1085_v31, %v1084_v30  ;;  %v862_v42 = vadd.f32 %v1083_v29, %v993_v39 }
 0x2d9   :  { %v865_v48 = vadd.f32 %v1086_v32, %v993_v39 }
 0x2db   :  { %v1087_v33 = vpop.f32.mrb[20].mxu0 }
 0x2dc   :  { %v1088_v34 = vpop.f32.mrb[21].mxu0 }
 0x2dd   :  { %v1089_v35 = vadd.f32 %v1088_v34, %v1087_v33  ;;  %v1090_v36 = vpop.f32.mrb[22].mxu0 }
 0x2de   :  { %v1091_v37 = vpop.f32.mrb[23].mxu0 }
 0x2df   :  { %v1092_v38 = vadd.f32 %v1091_v37, %v1090_v36  ;;  %v870_v40 = vadd.f32 %v1089_v35, %v993_v39 }
 0x2e1   :  { %v873_v45 = vadd.f32 %v1092_v38, %v993_v39 }
 0x2eb   :  { %v1197_v41 = vpop.f32.mrb[8].mxu1 }
 0x2ec   :  { %v919_v43 = vadd.f32 %v1197_v41, %v870_v40  ;;  %v910_v44 = vpop.f32.mrb[9].mxu1 }
 0x2ed   :  { %v911_v46 = vadd.f32 %v910_v44, %v862_v42  ;;  %v1198_v47 = vpop.f32.mrb[10].mxu1 }
 0x2ee   :  { %v927_v49 = vmax.f32 %v919_v43, 0.0  ;;  %v922_v50 = vadd.f32 %v1198_v47, %v873_v45  ;;  %v913_v51 = vpop.f32.mrb[11].mxu1 }
 0x2ef   :  { %v925_v52 = vmax.f32 %v911_v46, 0.0  ;;  %v914_v53 = vadd.f32 %v913_v51, %v865_v48 }
 0x2f0   :  { %931 = vst [vmem:[#allocation9 + $0x10] sm:$0xff] %v927_v49  ;;  %v928_v54 = vmax.f32 %v922_v50, 0.0 }
 0x2f1   :  { %929 = vst [vmem:[#allocation9] sm:$0xff] %v925_v52  ;;  %v926_v55 = vmax.f32 %v914_v53, 0.0 }
 0x2f2   :  { %932 = vst [vmem:[#allocation9 + $0x18] sm:$0xff] %v928_v54 }
 0x2f3   :  { %930 = vst [vmem:[#allocation9 + $0x8] sm:$0xff] %v926_v55 }
 0x2f4   :  { %1324 = shalt.err (!%p1321_p11)
}
 0x2f5   :  { %s1325_s10 = scalar_lea.hbm %s1479_s7, 512 }
 0x2f6   :  { %p1326_p12 = scmp.ne.s32.totalorder %s1479_s7, %s1325_s10  ;;  %p1329_p13 = scmp.lt.u32.totalorder %s1325_s10, %s1479_s7 }
 0x2f8   :  { %p1331_p0 = pnand %p1329_p13, %p1326_p12 }
 0x2fa   :  { %1334 = shalt.err (!%p1331_p0)
}
 0x2fb   :  { %s1349_s13 = smov 128   ;;  %s1350_s14 = smov 8  }
 0x2fc   :  { %944 = dma.vmem_to_hbm [thread:$0]  %s939_s30, 512, %s1479_s7, [#allocation4], %s1349_s13, %s1349_s13, %s1350_s14  }
 0x2fd   :  { %1341 = dma.done.wait [#allocation4], 512  }
 0x2fe   :  { %1342 = vsyncadd [#allocation4], 4294966784 }
 0x2ff   :  { %948 = vsyncpa [#allocation3], 1 }
 0x300   :  { %949 = vsyncpa [#allocation8], 1 }
 0x301   :  { %950 = vsyncpa [#allocation4], 1 }
 0x302   :  { %951 = vsyncpa [#allocation5], 1 }

// kernel: tpu_custom_call.1
= control target key start
LH: loop header
LB: loop body
LE: loop exit
PB: predicated region body
PF: predicated region fallthrough
CT: control target
= control target key end

     0   :  { %12 = vsyncpa [#allocation5], 0  ;;  %s1472_s0 = inlined_call_operand.vmem [shape: f32[3], index: 0, kind: input, shape index: {}]   ;;  %s1473_s1 = inlined_call_operand.vmem [shape: s8[96,32], index: 1, kind: input, shape index: {}]   ;;  %s1474_s2 = inlined_call_operand.vmem [shape: bf16[32,128], index: 2, kind: input, shape index: {}]   ;;  %s1475_s3 = inlined_call_operand.hbm [shape: bf16[3,128,128], index: 3, kind: input, shape index: {}]   ;;  %s1476_s4 = inlined_call_operand.vmem [shape: f32[3,1,128], index: 4, kind: input, shape index: {}]   ;;  %s1477_s5 = inlined_call_operand.hbm [shape: bf16[384,128], index: 5, kind: input, shape index: {}]   ;;  %s1478_s6 = inlined_call_operand.vmem [shape: f32[1,128], index: 6, kind: input, shape index: {}]   ;;  %s1479_s7 = inlined_call_operand.hbm [shape: f32[32,128], index: 7, kind: output, shape index: {}]  }
   0x1   :  { %13 = vsyncpa [#allocation3], 0 }
   0x2   :  { %14 = vsyncpa [#allocation8], 0 }
   0x3   :  { %15 = vsyncpa [#allocation4], 0  ;;  %s22_s26 = sshll.u32 %s1472_s0, 4  ;;  %s23_s26 = int_to_ptr.vmem [resolvable:$true] %s22_s26 }
   0x4   :  { %s1257_s27 = scalar_lea.vmem %s23_s26, 16  ;;  %p1262_p1 = scmp.lt.s32.totalorder %s23_s26, %s23_s26 }
   0x5   :  { %p1258_p0 = scmp.ne.s32.totalorder %s23_s26, %s1257_s27  ;;  %p1263_p2 = scmp.lt.s32.totalorder %s1257_s27, %s1257_s27 }
   0x7   :  { %p1264_p3 = por %p1263_p2, %p1262_p1 }
   0x9   :  { %p1265_p4 = pnand %p1264_p3, %p1258_p0 }
   0xb   :  { %1268 = shalt.err (!%p1265_p4)
}
   0xc   :  { %s1343_s28 = smov [#allocation2]   ;;  %s1344_s29 = smov [#allocation6]  }
   0xd   :  { %25 = dma.vmem_to_smem %s23_s26, 16, %s1343_s28, [#allocation5]  }
   0xe   :  { %s35_s30 = sshll.u32 %s1344_s29, 4  ;;  %s1269_s10 = scalar_lea.hbm %s1475_s3, 3072  ;;  %s36_s30 = int_to_ptr.vmem [resolvable:$true] %s35_s30 }
   0xf   :  { %p1270_p5 = scmp.ne.s32.totalorder %s1475_s3, %s1269_s10  ;;  %p1273_p6 = scmp.lt.u32.totalorder %s1269_s10, %s1475_s3 }
  0x11   :  { %p1275_p7 = pnand %p1273_p6, %p1270_p5 }
  0x13   :  { %1278 = shalt.err (!%p1275_p7)
}
  0x14   :  { %s1279_s14 = scalar_lea.vmem %s36_s30, 3072  ;;  %p1284_p9 = scmp.lt.s32.totalorder %s36_s30, %s36_s30 }
  0x15   :  { %p1280_p8 = scmp.ne.s32.totalorder %s36_s30, %s1279_s14  ;;  %p1285_p10 = scmp.lt.s32.totalorder %s1279_s14, %s1279_s14 }
  0x17   :  { %p1286_p11 = por %p1285_p10, %p1284_p9 }
  0x19   :  { %p1287_p12 = pnand %p1286_p11, %p1280_p8 }
  0x1b   :  { %1290 = shalt.err (!%p1287_p12)
}
  0x1c   :  { %s1345_s15 = smov 64   ;;  %s1346_s16 = smov 4  }
  0x1d   :  { %41 = dma.hbm_to_vmem [thread:$0]  %s1475_s3, 3072, %s36_s30, [#allocation3], %s1345_s15, %s1345_s15, %s1346_s16  }
  0x1e   :  { %s1347_s19 = smov [#allocation7]   ;;  %s1291_s23 = scalar_lea.hbm %s1477_s5, 3072 }
  0x1f   :  { %s49_s20 = sshll.u32 %s1347_s19, 4  ;;  %p1292_p13 = scmp.ne.s32.totalorder %s1477_s5, %s1291_s23  ;;  %s50_s20 = int_to_ptr.vmem [resolvable:$true] %s49_s20 }
  0x20   :  { %p1295_p0 = scmp.lt.u32.totalorder %s1291_s23, %s1477_s5 }
  0x22   :  { %p1297_p1 = pnand %p1295_p0, %p1292_p13 }
  0x24   :  { %1300 = shalt.err (!%p1297_p1)
}
  0x25   :  { %s1301_s28 = scalar_lea.vmem %s50_s20, 3072  ;;  %p1306_p3 = scmp.lt.s32.totalorder %s50_s20, %s50_s20 }
  0x26   :  { %p1302_p2 = scmp.ne.s32.totalorder %s50_s20, %s1301_s28  ;;  %p1307_p4 = scmp.lt.s32.totalorder %s1301_s28, %s1301_s28 }
  0x28   :  { %p1308_p5 = por %p1307_p4, %p1306_p3 }
  0x2a   :  { %p1309_p6 = pnand %p1308_p5, %p1302_p2 }
  0x2c   :  { %1312 = shalt.err (!%p1309_p6)
}
  0x2d   :  { %55 = dma.hbm_to_vmem [thread:$0]  %s1477_s5, 3072, %s50_s20, [#allocation8], %s1345_s15, %s1345_s15, %s1346_s16  }
  0x2e   :  { %1335 = dma.done.wait [#allocation5], 16  }
  0x2f   :  { %1336 = vsyncadd [#allocation5], 4294967280 }
  0x30   :  { %1337 = dma.done.wait [#allocation3], 3072  }
  0x31   :  { %1338 = vsyncadd [#allocation3], 4294964224 }
  0x32   :  { %1339 = dma.done.wait [#allocation8], 3072  }
  0x33   :  { %1340 = vsyncadd [#allocation8], 4294964224 }
  0x34   :  { %67 = sfence }
  0x35   :  { %v1207_v0 = vld [vmem:[%s1474_s2] sm:$0xff]   ;;  %v1208_v1 = vld [vmem:[%s1474_s2 + $0x8] sm:$0xff]   ;;  %vm107_vm0 = vcmask 261120   ;;  %v1211_v10 = vld [vmem:[#allocation6 + $0x10] sm:$0xff]   ;;  %s971_s15 = sld [smem:[#allocation2 + $0x1]]  ;;  %s1445_s22 = sld [smem:[#allocation2 + $0x2]] }
  0x36   :  { %1103 = vmatprep.subr.bf16.mxu0 %v1207_v0  ;;  %v86_v2 = vld [vmem:[%s1473_s1] sm:$0xff]  ;;  %v87_v3 = vld [vmem:[%s1473_s1 + $0x8] sm:$0xff]  ;;  %v1213_v12 = vld [vmem:[#allocation6 + $0x18] sm:$0xff]   ;;  %s1348_s29 = smov [#allocation9]  }
  0x37   :  { %1104 = vmatpush3.bf16.msra.mxu0 %v1207_v0  ;;  %v89_v4 = vunpack.c.l.s8.bf16 %v86_v2  ;;  %v1209_v5 = vld [vmem:[#allocation6] sm:$0xff]   ;;  %v1210_v6 = vld [vmem:[#allocation6 + $0x8] sm:$0xff]   ;;  %v90_v7 = vunpack.c.h.s8.bf16 %v86_v2  ;;  %v91_v9 = vunpack.c.l.s8.bf16 %v87_v3  ;;  %v88_v13 = vld [vmem:[%s1473_s1 + $0x10] sm:$0xff]  ;;  %v92_v16 = vunpack.c.h.s8.bf16 %v87_v3  ;;  %s207_s1 = sld [smem:[#allocation2]]  ;;  %s938_s30 = sshll.u32 %s1348_s29, 4  ;;  %s939_s30 = int_to_ptr.vmem [resolvable:$true] %s938_s30 }
  0x38   :  { %1105 = vmatprep.subr.bf16.mxu0 %v1208_v1  ;;  %1119 = vmatprep.subr.bf16.mxu1 %v1209_v5  ;;  %v1212_v8 = vld [vmem:[#allocation6 + $0x40] sm:$0xff]   ;;  %v1214_v11 = vld [vmem:[#allocation6 + $0x48] sm:$0xff]   ;;  %v1216_v15 = vld [vmem:[#allocation6 + $0x50] sm:$0xff]   ;;  %v93_v17 = vunpack.c.l.s8.bf16 %v88_v13  ;;  %v94_v20 = vunpack.c.h.s8.bf16 %v88_v13  ;;  %p1318_p8 = scmp.lt.s32.totalorder %s939_s30, %s939_s30 }
  0x39   :  { %1107 = vmatprep.mubr.msk.bf16.mxu0 %vm107_vm0, %v89_v4  ;;  %1120 = vmatpush3.bf16.msra.mxu1 %v1209_v5  ;;  %v1215_v14 = vld [vmem:[#allocation6 + $0x20] sm:$0xff]   ;;  %v1218_v18 = vld [vmem:[#allocation6 + $0x58] sm:$0xff]   ;;  %v1217_v19 = vld [vmem:[#allocation6 + $0x28] sm:$0xff]  }
  0x3a   :  { %1121 = vmatprep.subr.bf16.mxu1 %v1210_v6  ;;  %v1219_v21 = vld [vmem:[#allocation6 + $0x30] sm:$0xff]   ;;  %v1220_v22 = vld [vmem:[#allocation6 + $0x60] sm:$0xff]   ;;  %v1221_v23 = vld [vmem:[#allocation6 + $0x38] sm:$0xff]  }
  0x3b   :  { %1106 = vmatpush3.bf16.msra.mxu0 %v1208_v1  ;;  %v1222_v24 = vld [vmem:[#allocation6 + $0x68] sm:$0xff]   ;;  %v1223_v25 = vld [vmem:[#allocation6 + $0x80] sm:$0xff]   ;;  %v1224_v26 = vld [vmem:[#allocation6 + $0x70] sm:$0xff]   ;;  %s347_s21 = sadd.f32 1.0, %s971_s15 }
  0x3c   :  { %1139 = vmatprep.subr.bf16.mxu0 %v1212_v8  ;;  %v1226_v27 = vld [vmem:[#allocation6 + $0x78] sm:$0xff]   ;;  %v1233_v28 = vld [vmem:[#allocation7 + $0x40] sm:$0xff]   ;;  %v1026_v29 = vld [vmem:[%s1474_s2 + $0x8] sm:$0xff]  }
  0x3d   :  { %1122 = vmatpush3.bf16.msra.mxu1 %v1210_v6  ;;  %s208_s18 = sadd.f32 1.0, %s207_s1  ;;  %v1019_v30 = vld [vmem:[%s1474_s2] sm:$0xff]   ;;  %v1024_v31 = vunpack.c.l.bf16 %v1026_v29  ;;  %v1025_v32 = vunpack.c.h.bf16 %v1026_v29  ;;  %v348_v43 = vstv %s347_s21  ;;  %v1225_v54 = vld [vmem:[#allocation6 + $0x88] sm:$0xff]   ;;  %v1227_v0 = vld [vmem:[#allocation6 + $0x90] sm:$0xff]  }
  0x3e   :  { %1108 = vmatmul.mubr.msk.bf16.vlgmr.msra.gmra.mrb[0].mxu0 %vm107_vm0, %v90_v7  ;;  %1123 = vmatprep.subr.bf16.mxu1 %v1211_v10  ;;  %v1020_v34 = vunpack.c.l.bf16 %v1019_v30  ;;  %v1021_v35 = vunpack.c.h.bf16 %v1019_v30  ;;  %s488_s2 = sadd.f32 1.0, %s1445_s22  ;;  %v1234_v6 = vld [vmem:[#allocation7] sm:$0xff]   ;;  %v1228_v7 = vld [vmem:[#allocation6 + $0x98] sm:$0xff]  }
  0x3f   :  { %1111 = vmatprep.mubr.msk.bf16.mxu0 %vm107_vm0, %v91_v9  ;;  %1140 = vmatpush3.bf16.msra.mxu0 %v1212_v8  ;;  %v209_v33 = vstv %s208_s18  ;;  %v351_v50 = vmul.f32 %v1024_v31, %v348_v43  ;;  %v352_v53 = vmul.f32 %v1025_v32, %v348_v43  ;;  %v1235_v9 = vld [vmem:[#allocation7 + $0x48] sm:$0xff]   ;;  %v1240_v29 = vld [vmem:[#allocation7 + $0x18] sm:$0xff]   ;;  %v1241_v30 = vld [vmem:[#allocation7 + $0x60] sm:$0xff]  }
  0x40   :  { %1141 = vmatprep.subr.bf16.mxu0 %v1214_v11  ;;  %v212_v36 = vmul.f32 %v1024_v31, %v209_v33  ;;  %v213_v37 = vmul.f32 %v1025_v32, %v209_v33  ;;  %v210_v39 = vmul.f32 %v1020_v34, %v209_v33  ;;  %v211_v40 = vmul.f32 %v1021_v35, %v209_v33  ;;  %v1244_v33 = vld [vmem:[#allocation7 + $0x28] sm:$0xff]  }
  0x41   :  { %1124 = vmatpush3.bf16.msra.mxu1 %v1211_v10  ;;  %v349_v52 = vmul.f32 %v1020_v34, %v348_v43  ;;  %v350_v56 = vmul.f32 %v1021_v35, %v348_v43  ;;  %v489_v61 = vstv %s488_s2  ;;  %v1254_v43 = vld [vmem:[#allocation7 + $0xa8] sm:$0xff]  }
  0x42   :  { %1125 = vmatprep.subr.bf16.mxu1 %v1213_v12  ;;  %v492_v3 = vmul.f32 %v1024_v31, %v489_v61  ;;  %v490_v5 = vmul.f32 %v1020_v34, %v489_v61  ;;  %v493_v8 = vmul.f32 %v1025_v32, %v489_v61  ;;  %v1242_v31 = vld [vmem:[#allocation7 + $0x20] sm:$0xff]   ;;  %v1243_v32 = vld [vmem:[#allocation7 + $0x68] sm:$0xff]  }
  0x43   :  { %1142 = vmatpush3.bf16.msra.mxu0 %v1214_v11  ;;  %v491_v11 = vmul.f32 %v1021_v35, %v489_v61  ;;  %v1245_v34 = vld [vmem:[#allocation7 + $0x80] sm:$0xff]   ;;  %v1246_v35 = vld [vmem:[#allocation7 + $0x70] sm:$0xff]  }
  0x44   :  { %1143 = vmatprep.subr.bf16.mxu0 %v1216_v15 }
  0x45   :  { %1126 = vmatpush3.bf16.msra.mxu1 %v1213_v12 }
  0x46   :  { %1112 = vmatmul.mubr.msk.bf16.gmra.mrb[4].mxu0 %vm107_vm0, %v92_v16  ;;  %1127 = vmatprep.subr.bf16.mxu1 %v1215_v14  ;;  %v1236_v16 = vld [vmem:[#allocation7 + $0x8] sm:$0xff]  }
  0x47   :  { %1115 = vmatprep.mubr.msk.bf16.mxu0 %vm107_vm0, %v93_v17  ;;  %1144 = vmatpush3.bf16.msra.mxu0 %v1216_v15  ;;  %v1229_v17 = vld [vmem:[#allocation6 + $0xa0] sm:$0xff]  }
  0x48   :  { %1145 = vmatprep.subr.bf16.mxu0 %v1218_v18 }
  0x49   :  { %1128 = vmatpush3.bf16.msra.mxu1 %v1215_v14 }
  0x4a   :  { %1129 = vmatprep.subr.bf16.mxu1 %v1217_v19 }
  0x4b   :  { %1146 = vmatpush3.bf16.msra.mxu0 %v1218_v18 }
  0x4c   :  { %1147 = vmatprep.subr.bf16.mxu0 %v1220_v22 }
  0x4d   :  { %1130 = vmatpush3.bf16.msra.mxu1 %v1217_v19 }
  0x4e   :  { %1116 = vmatmul.mubr.msk.bf16.gmra.mrb[8].mxu0 %vm107_vm0, %v94_v20  ;;  %1131 = vmatprep.subr.bf16.mxu1 %v1219_v21  ;;  %v1237_v20 = vld [vmem:[#allocation7 + $0x50] sm:$0xff]  }
  0x4f   :  { %1148 = vmatpush3.bf16.msra.mxu0 %v1220_v22 }
  0x50   :  { %1149 = vmatprep.subr.bf16.mxu0 %v1222_v24 }
  0x51   :  { %1132 = vmatpush3.bf16.msra.mxu1 %v1219_v21 }
  0x52   :  { %1133 = vmatprep.subr.bf16.mxu1 %v1221_v23 }
  0x53   :  { %1150 = vmatpush3.bf16.msra.mxu0 %v1222_v24  ;;  %v1238_v24 = vld [vmem:[#allocation7 + $0x10] sm:$0xff]  }
  0x54   :  { %1151 = vmatprep.subr.bf16.mxu0 %v1224_v26 }
  0x55   :  { %1134 = vmatpush3.bf16.msra.mxu1 %v1221_v23 }
  0x56   :  { %1159 = vmatprep.subr.bf16.mxu1 %v1223_v25 }
  0x57   :  { %1152 = vmatpush3.bf16.msra.mxu0 %v1224_v26  ;;  %v1239_v26 = vld [vmem:[#allocation7 + $0x58] sm:$0xff]  }
  0x58   :  { %1153 = vmatprep.subr.bf16.mxu0 %v1226_v27 }
  0x5b   :  { %1154 = vmatpush3.bf16.msra.mxu0 %v1226_v27  ;;  %v1231_v27 = vld [vmem:[#allocation6 + $0xb0] sm:$0xff]  }
  0x5c   :  { %1065 = vmatprep.subr.bf16.mxu0 %v1233_v28  ;;  %v1232_v28 = vld [vmem:[#allocation6 + $0xb8] sm:$0xff]  }
 0x111   :  { %v1109_v38 = vpop.f32.mrb[0].mxu0 }
 0x112   :  { %v160_v41 = vpop.f32.mrb[1].mxu0  ;;  %v216_v44 = vadd.f32 %v1109_v38, %v212_v36  ;;  %v1247_v36 = vld [vmem:[#allocation7 + $0x30] sm:$0xff]   ;;  %v1249_v38 = vld [vmem:[#allocation7 + $0x78] sm:$0xff]  }
 0x113   :  { %v1110_v42 = vpop.f32.mrb[2].mxu0  ;;  %v214_v47 = vadd.f32 %v210_v39, %v160_v41  ;;  %v1250_v39 = vld [vmem:[#allocation7 + $0x38] sm:$0xff]  }
 0x114   :  { %v217_v45 = vadd.f32 %v1110_v42, %v213_v37  ;;  %v163_v46 = vpop.f32.mrb[3].mxu0  ;;  %v1248_v37 = vld [vmem:[#allocation7 + $0x88] sm:$0xff]   ;;  %v1252_v41 = vld [vmem:[#allocation7 + $0x98] sm:$0xff]   ;;  %v1253_v42 = vld [vmem:[#allocation7 + $0xa0] sm:$0xff]  }
 0x115   :  { %v215_v48 = vadd.f32 %v211_v40, %v163_v46  ;;  %v1251_v40 = vld [vmem:[#allocation7 + $0x90] sm:$0xff]   ;;  %v962_v46 = vld [vmem:[%s1476_s4] ss:$0 sm:$0xff] }
 0x116   :  { %v219_v49 = vpack.c.bf16 %v217_v45, %v216_v44  ;;  %v1255_v44 = vld [vmem:[#allocation7 + $0xb0] sm:$0xff]   ;;  %v1256_v45 = vld [vmem:[#allocation7 + $0xb8] sm:$0xff]  }
 0x117   :  { %v218_v51 = vpack.c.bf16 %v215_v48, %v214_v47 }
 0x119   :  { %v1113_v55 = vpop.f32.mrb[4].mxu0  ;;  %1135 = vmatprep.mubr.bf16.mxu1 %v218_v51 }
 0x11a   :  { %v355_v57 = vadd.f32 %v1113_v55, %v351_v50  ;;  %v176_v58 = vpop.f32.mrb[5].mxu0  ;;  %1136 = vmatmul.mubr.bf16.vlgmr.msra.gmra.mrb[0].mxu1 %v219_v49 }
 0x11b   :  { %v353_v59 = vadd.f32 %v349_v52, %v176_v58  ;;  %1160 = vmatpush3.bf16.msra.mxu1 %v1223_v25  ;;  %v1114_v60 = vpop.f32.mrb[6].mxu0  ;;  %v1230_v25 = vld [vmem:[#allocation6 + $0xa8] sm:$0xff]  }
 0x11c   :  { %v356_v62 = vadd.f32 %v1114_v60, %v352_v53  ;;  %v179_v63 = vpop.f32.mrb[7].mxu0  ;;  %1161 = vmatprep.subr.bf16.mxu1 %v1225_v54  ;;  %v973_v60 = vld [vmem:[%s1476_s4 + $0x1] ss:$0 sm:$0xff] }
 0x11d   :  { %v354_v1 = vadd.f32 %v350_v56, %v179_v63 }
 0x11e   :  { %v358_v2 = vpack.c.bf16 %v356_v62, %v355_v57 }
 0x11f   :  { %v357_v4 = vpack.c.bf16 %v354_v1, %v353_v59  ;;  %1162 = vmatpush3.bf16.msra.mxu1 %v1225_v54 }
 0x120   :  { %1163 = vmatprep.subr.bf16.mxu1 %v1227_v0 }
 0x121   :  { %1155 = vmatprep.mubr.bf16.mxu0 %v357_v4  ;;  %v1117_v10 = vpop.f32.mrb[8].mxu0 }
 0x122   :  { %1156 = vmatmul.mubr.bf16.vlgmr.msra.gmra.mrb[12].mxu0 %v358_v2  ;;  %v496_v12 = vadd.f32 %v1117_v10, %v492_v3  ;;  %v192_v13 = vpop.f32.mrb[9].mxu0 }
 0x123   :  { %1164 = vmatpush3.bf16.msra.mxu1 %v1227_v0  ;;  %v494_v14 = vadd.f32 %v490_v5, %v192_v13  ;;  %v1118_v15 = vpop.f32.mrb[10].mxu0  ;;  %1066 = vmatpush3.bf16.msra.mxu0 %v1234_v6 }
 0x124   :  { %1165 = vmatprep.subr.bf16.mxu1 %v1228_v7  ;;  %v497_v18 = vadd.f32 %v1118_v15, %v493_v8  ;;  %v195_v19 = vpop.f32.mrb[11].mxu0  ;;  %1067 = vmatprep.subr.bf16.mxu0 %v1235_v9 }
 0x125   :  { %v495_v21 = vadd.f32 %v491_v11, %v195_v19 }
 0x126   :  { %v499_v22 = vpack.c.bf16 %v497_v18, %v496_v12  ;;  %v984_v12 = vld [vmem:[%s1476_s4 + $0x2] ss:$0 sm:$0xff] }
 0x127   :  { %1166 = vmatpush3.bf16.msra.mxu1 %v1228_v7  ;;  %v498_v23 = vpack.c.bf16 %v495_v21, %v494_v14  ;;  %1068 = vmatpush3.bf16.msra.mxu0 %v1236_v16 }
 0x128   :  { %1167 = vmatprep.subr.bf16.mxu1 %v1229_v17  ;;  %1069 = vmatprep.subr.bf16.mxu0 %v1237_v20 }
 0x129   :  { %1175 = vmatprep.mubr.bf16.mxu1 %v498_v23 }
 0x12b   :  { %1168 = vmatpush3.bf16.msra.mxu1 %v1229_v17  ;;  %1070 = vmatpush3.bf16.msra.mxu0 %v1238_v24 }
 0x12c   :  { %1169 = vmatprep.subr.bf16.mxu1 %v1230_v25  ;;  %1071 = vmatprep.subr.bf16.mxu0 %v1239_v26 }
 0x12f   :  { %1170 = vmatpush3.bf16.msra.mxu1 %v1230_v25  ;;  %1072 = vmatpush3.bf16.msra.mxu0 %v1240_v29 }
 0x130   :  { %1171 = vmatprep.subr.bf16.mxu1 %v1231_v27  ;;  %1073 = vmatprep.subr.bf16.mxu0 %v1241_v30 }
 0x133   :  { %1172 = vmatpush3.bf16.msra.mxu1 %v1231_v27  ;;  %1074 = vmatpush3.bf16.msra.mxu0 %v1242_v31 }
 0x134   :  { %1173 = vmatprep.subr.bf16.mxu1 %v1232_v28  ;;  %1075 = vmatprep.subr.bf16.mxu0 %v1243_v32 }
 0x137   :  { %1174 = vmatpush3.bf16.msra.mxu1 %v1232_v28  ;;  %1076 = vmatpush3.bf16.msra.mxu0 %v1244_v33 }
 0x138   :  { %1179 = vmatprep.subr.bf16.mxu1 %v1245_v34  ;;  %1077 = vmatprep.subr.bf16.mxu0 %v1246_v35 }
 0x13a   :  { %1176 = vmatmul.mubr.bf16.vlgmr.msra.gmra.mrb[4].mxu1 %v499_v22 }
 0x13b   :  { %1180 = vmatpush3.bf16.msra.mxu1 %v1245_v34  ;;  %1078 = vmatpush3.bf16.msra.mxu0 %v1247_v36 }
 0x13c   :  { %1181 = vmatprep.subr.bf16.mxu1 %v1248_v37  ;;  %1079 = vmatprep.subr.bf16.mxu0 %v1249_v38 }
 0x13f   :  { %1182 = vmatpush3.bf16.msra.mxu1 %v1248_v37  ;;  %1080 = vmatpush3.bf16.msra.mxu0 %v1250_v39  ;;  %v993_v39 = vld [vmem:[%s1478_s6] ss:$0 sm:$0xff]  ;;  %s1313_s6 = scalar_lea.vmem %s939_s30, 512 }
 0x140   :  { %1183 = vmatprep.subr.bf16.mxu1 %v1251_v40  ;;  %p1314_p7 = scmp.ne.s32.totalorder %s939_s30, %s1313_s6  ;;  %p1319_p9 = scmp.lt.s32.totalorder %s1313_s6, %s1313_s6 }
 0x142   :  { %p1320_p10 = por %p1319_p9, %p1318_p8 }
 0x143   :  { %1184 = vmatpush3.bf16.msra.mxu1 %v1251_v40 }
 0x144   :  { %1185 = vmatprep.subr.bf16.mxu1 %v1252_v41  ;;  %p1321_p11 = pnand %p1320_p10, %p1314_p7 }
 0x147   :  { %1186 = vmatpush3.bf16.msra.mxu1 %v1252_v41 }
 0x148   :  { %1187 = vmatprep.subr.bf16.mxu1 %v1253_v42 }
 0x14b   :  { %1188 = vmatpush3.bf16.msra.mxu1 %v1253_v42 }
 0x14c   :  { %1189 = vmatprep.subr.bf16.mxu1 %v1254_v43 }
 0x14f   :  { %1190 = vmatpush3.bf16.msra.mxu1 %v1254_v43 }
 0x150   :  { %1191 = vmatprep.subr.bf16.mxu1 %v1255_v44 }
 0x153   :  { %1192 = vmatpush3.bf16.msra.mxu1 %v1255_v44 }
 0x154   :  { %1193 = vmatprep.subr.bf16.mxu1 %v1256_v45 }
 0x157   :  { %1194 = vmatpush3.bf16.msra.mxu1 %v1256_v45 }
 0x1ed   :  { %v1137_v47 = vpop.f32.mrb[0].mxu1 }
 0x1ee   :  { %v334_v48 = vadd.f32 %v1137_v47, %v962_v46  ;;  %v325_v49 = vpop.f32.mrb[1].mxu1 }
 0x1ef   :  { %v326_v50 = vadd.f32 %v962_v46, %v325_v49  ;;  %v1138_v51 = vpop.f32.mrb[2].mxu1 }
 0x1f0   :  { %v337_v52 = vadd.f32 %v1138_v51, %v962_v46  ;;  %v328_v53 = vpop.f32.mrb[3].mxu1  ;;  %v342_v55 = vmax.f32 %v334_v48, 0.0 }
 0x1f1   :  { %v329_v54 = vadd.f32 %v962_v46, %v328_v53  ;;  %v340_v57 = vmax.f32 %v326_v50, 0.0 }
 0x1f2   :  { %v343_v56 = vmax.f32 %v337_v52, 0.0 }
 0x1f3   :  { %v341_v58 = vmax.f32 %v329_v54, 0.0 }
 0x1f4   :  { %v345_v59 = vpack.c.bf16 %v343_v56, %v342_v55 }
 0x1f5   :  { %v344_v61 = vpack.c.bf16 %v341_v58, %v340_v57  ;;  %v1157_v62 = vpop.f32.mrb[12].mxu0 }
 0x1f6   :  { %v475_v63 = vadd.f32 %v1157_v62, %v973_v60  ;;  %v466_v0 = vpop.f32.mrb[13].mxu0 }
 0x1f7   :  { %v467_v1 = vadd.f32 %v973_v60, %v466_v0  ;;  %v1158_v2 = vpop.f32.mrb[14].mxu0 }
 0x1f8   :  { %v483_v3 = vmax.f32 %v475_v63, 0.0  ;;  %v478_v4 = vadd.f32 %v1158_v2, %v973_v60  ;;  %v469_v5 = vpop.f32.mrb[15].mxu0 }
 0x1f9   :  { %v481_v6 = vmax.f32 %v467_v1, 0.0  ;;  %v470_v7 = vadd.f32 %v973_v60, %v469_v5 }
 0x1fa   :  { %v484_v8 = vmax.f32 %v478_v4, 0.0 }
 0x1fb   :  { %v482_v9 = vmax.f32 %v470_v7, 0.0 }
 0x1fc   :  { %v486_v10 = vpack.c.bf16 %v484_v8, %v483_v3 }
 0x1fd   :  { %v485_v11 = vpack.c.bf16 %v482_v9, %v481_v6 }
 0x1ff   :  { %859 = vmatprep.mubr.bf16.mxu0 %v485_v11 }
 0x200   :  { %860 = vmatmul.mubr.bf16.vlgmr.msra.gmra.mrb[16].mxu0 %v344_v61 }
 0x201   :  { %867 = vmatprep.mubr.bf16.mxu0 %v486_v10 }
 0x208   :  { %868 = vmatmul.mubr.bf16.gmra.mrb[20].mxu0 %v345_v59 }
 0x20d   :  { %v1177_v13 = vpop.f32.mrb[4].mxu1 }
 0x20e   :  { %v616_v14 = vadd.f32 %v1177_v13, %v984_v12  ;;  %v607_v15 = vpop.f32.mrb[5].mxu1 }
 0x20f   :  { %v608_v16 = vadd.f32 %v984_v12, %v607_v15  ;;  %v1178_v17 = vpop.f32.mrb[6].mxu1 }
 0x210   :  { %v619_v18 = vadd.f32 %v1178_v17, %v984_v12  ;;  %v610_v19 = vpop.f32.mrb[7].mxu1  ;;  %v624_v21 = vmax.f32 %v616_v14, 0.0 }
 0x211   :  { %v611_v20 = vadd.f32 %v984_v12, %v610_v19  ;;  %v622_v23 = vmax.f32 %v608_v16, 0.0 }
 0x212   :  { %v625_v22 = vmax.f32 %v619_v18, 0.0 }
 0x213   :  { %v623_v24 = vmax.f32 %v611_v20, 0.0 }
 0x214   :  { %v627_v25 = vpack.c.bf16 %v625_v22, %v624_v21 }
 0x215   :  { %v626_v26 = vpack.c.bf16 %v623_v24, %v622_v23 }
 0x217   :  { %1195 = vmatprep.mubr.bf16.mxu1 %v626_v26 }
 0x218   :  { %1196 = vmatmul.mubr.bf16.vlgmr.msra.gmra.mrb[8].mxu1 %v627_v25 }
 0x2d3   :  { %v1081_v27 = vpop.f32.mrb[16].mxu0 }
 0x2d4   :  { %v1082_v28 = vpop.f32.mrb[17].mxu0 }
 0x2d5   :  { %v1083_v29 = vadd.f32 %v1082_v28, %v1081_v27  ;;  %v1084_v30 = vpop.f32.mrb[18].mxu0 }
 0x2d6   :  { %v1085_v31 = vpop.f32.mrb[19].mxu0 }
 0x2d7   :  { %v1086_v32 = vadd.f32 %v1085_v31, %v1084_v30  ;;  %v862_v42 = vadd.f32 %v1083_v29, %v993_v39 }
 0x2d9   :  { %v865_v48 = vadd.f32 %v1086_v32, %v993_v39 }
 0x2db   :  { %v1087_v33 = vpop.f32.mrb[20].mxu0 }
 0x2dc   :  { %v1088_v34 = vpop.f32.mrb[21].mxu0 }
 0x2dd   :  { %v1089_v35 = vadd.f32 %v1088_v34, %v1087_v33  ;;  %v1090_v36 = vpop.f32.mrb[22].mxu0 }
 0x2de   :  { %v1091_v37 = vpop.f32.mrb[23].mxu0 }
 0x2df   :  { %v1092_v38 = vadd.f32 %v1091_v37, %v1090_v36  ;;  %v870_v40 = vadd.f32 %v1089_v35, %v993_v39 }
 0x2e1   :  { %v873_v45 = vadd.f32 %v1092_v38, %v993_v39 }
 0x2eb   :  { %v1197_v41 = vpop.f32.mrb[8].mxu1 }
 0x2ec   :  { %v919_v43 = vadd.f32 %v1197_v41, %v870_v40  ;;  %v910_v44 = vpop.f32.mrb[9].mxu1 }
 0x2ed   :  { %v911_v46 = vadd.f32 %v910_v44, %v862_v42  ;;  %v1198_v47 = vpop.f32.mrb[10].mxu1 }
 0x2ee   :  { %v927_v49 = vmax.f32 %v919_v43, 0.0  ;;  %v922_v50 = vadd.f32 %v1198_v47, %v873_v45  ;;  %v913_v51 = vpop.f32.mrb[11].mxu1 }
 0x2ef   :  { %v925_v52 = vmax.f32 %v911_v46, 0.0  ;;  %v914_v53 = vadd.f32 %v913_v51, %v865_v48 }
 0x2f0   :  { %931 = vst [vmem:[#allocation9 + $0x10] sm:$0xff] %v927_v49  ;;  %v928_v54 = vmax.f32 %v922_v50, 0.0 }
 0x2f1   :  { %929 = vst [vmem:[#allocation9] sm:$0xff] %v925_v52  ;;  %v926_v55 = vmax.f32 %v914_v53, 0.0 }
 0x2f2   :  { %932 = vst [vmem:[#allocation9 + $0x18] sm:$0xff] %v928_v54 }
 0x2f3   :  { %930 = vst [vmem:[#allocation9 + $0x8] sm:$0xff] %v926_v55 }
 0x2f4   :  { %1324 = shalt.err (!%p1321_p11)
}
 0x2f5   :  { %s1325_s10 = scalar_lea.hbm %s1479_s7, 512 }
 0x2f6   :  { %p1326_p12 = scmp.ne.s32.totalorder %s1479_s7, %s1325_s10  ;;  %p1329_p13 = scmp.lt.u32.totalorder %s1325_s10, %s1479_s7 }
 0x2f8   :  { %p1331_p0 = pnand %p1329_p13, %p1326_p12 }
 0x2fa   :  { %1334 = shalt.err (!%p1331_p0)
}
 0x2fb   :  { %s1349_s13 = smov 128   ;;  %s1350_s14 = smov 8  }
 0x2fc   :  { %944 = dma.vmem_to_hbm [thread:$0]  %s939_s30, 512, %s1479_s7, [#allocation4], %s1349_s13, %s1349_s13, %s1350_s14  }
 0x2fd   :  { %1341 = dma.done.wait [#allocation4], 512  }
 0x2fe   :  { %1342 = vsyncadd [#allocation4], 4294966784 }
 0x2ff   :  { %948 = vsyncpa [#allocation3], 1 }
 0x300   :  { %949 = vsyncpa [#allocation8], 1 }
 0x301   :  { %950 = vsyncpa [#allocation4], 1 }
 0x302   :  { %951 = vsyncpa [#allocation5], 1 }

</bundles_post_ra>
